<compile_context>
chip_gen: v5e
topology: v5e:2x2
jax: 0.10.0
libtpu: 0.0.40
codegen_flags: <defaults>
</compile_context>

<pallas_src>
import functools

import jax
import jax.numpy as jnp
from jax.experimental import pallas as pl
from jax.experimental.pallas import tpu as pltpu


# ---------------------------------------------------------------------------
# Fused bottleneck kernel: one image (flattened, guarded spatial grid) / step
# ---------------------------------------------------------------------------
def _bottleneck_kernel(x_ref, mask_ref, w1_ref, b1_ref, w2_ref, b2_ref,
                       w3_ref, b3_ref, o_ref, h1_scr,
                       *, tap_offsets, rows_out, guard, c2p):
    # ---- stage 1: 1x1 conv (BN scale pre-folded) + bias + ReLU -------------
    x = x_ref[...]                                            # (RG, C1p) bf16
    h1 = jnp.dot(x, w1_ref[...], preferred_element_type=jnp.float32)
    h1 = jnp.maximum(h1 + b1_ref[...], 0.0) * mask_ref[...]   # zero halo/guard
    h1_scr[...] = h1.astype(h1_scr.dtype)                     # stays in VMEM

    # ---- stage 2: kxk 'same' conv as tap-wise row-shifted accumulation -----
    acc = None
    for t, off in enumerate(tap_offsets):                     # static unroll
        lhs = h1_scr[pl.ds(off, rows_out), :]                 # (Ro, C2p) bf16
        rhs = w2_ref[pl.ds(t * c2p, c2p), :]                  # (C2p, C2p) bf16
        d = jnp.dot(lhs, rhs, preferred_element_type=jnp.float32)
        acc = d if acc is None else acc + d
    h2 = jnp.maximum(acc + b2_ref[...], 0.0).astype(jnp.bfloat16)

    # ---- stage 3: 1x1 conv + bias + residual + ReLU ------------------------
    res = x_ref[pl.ds(guard, rows_out), :].astype(jnp.float32)
    y = jnp.dot(h2, w3_ref[...], preferred_element_type=jnp.float32)
    o_ref[...] = jnp.maximum(y + b3_ref[...] + res, 0.0).astype(o_ref.dtype)


# ---------------------------------------------------------------------------
# Helpers
# ---------------------------------------------------------------------------
def _round_up(x, m):
    return ((x + m - 1) // m) * m


def fold_bn(gamma, beta, mean, var, eps=1e-5):
    scale = gamma * jax.lax.rsqrt(var + eps)
    bias = beta - mean * scale
    return scale, bias


# ---------------------------------------------------------------------------
# Bottleneck module (parameters initialized deterministically in-script)
# ---------------------------------------------------------------------------
class BottleneckPallas:
    def __init__(self, kernel, in_channels, out_channels, key):
        assert kernel % 2 == 1, "only odd ('same'-padding) kernels supported"
        self.kernel = kernel
        self.cin = in_channels
        self.cout = out_channels
        self.c1p = _round_up(in_channels, 128)    # lane-dense channel padding
        self.c2p = _round_up(out_channels, 128)
        ks = jax.random.split(key, 15)

        def w(k, shape, fan_in):
            return jax.random.normal(k, shape, jnp.float32) * (fan_in ** -0.5)

        w1 = w(ks[0], (in_channels, out_channels), in_channels)
        w2 = w(ks[1], (kernel, kernel, out_channels, out_channels),
               kernel * kernel * out_channels)
        w3 = w(ks[2], (out_channels, in_channels), out_channels)

        def bn_params(k0, k1, k2, k3, c):
            gamma = 1.0 + 0.1 * jax.random.normal(k0, (c,), jnp.float32)
            beta = 0.1 * jax.random.normal(k1, (c,), jnp.float32)
            mean = 0.1 * jax.random.normal(k2, (c,), jnp.float32)
            var = 1.0 + 0.1 * jax.random.uniform(k3, (c,), jnp.float32)
            return fold_bn(gamma, beta, mean, var)

        s1, b1 = bn_params(*ks[3:7], out_channels)
        s2, b2 = bn_params(*ks[7:11], out_channels)
        s3, b3 = bn_params(*ks[11:15], in_channels)

        # Fold BN scale into the conv weights; keep only the bias add.
        w1f = w1 * s1[None, :]
        w2f = w2 * s2[None, None, None, :]
        w3f = w3 * s3[None, :]

        c1p, c2p, k = self.c1p, self.c2p, kernel
        self.w1p = jnp.pad(w1f, ((0, c1p - in_channels),
                                 (0, c2p - out_channels))).astype(jnp.bfloat16)
        w2p = jnp.pad(w2f, ((0, 0), (0, 0),
                            (0, c2p - out_channels),
                            (0, c2p - out_channels)))
        self.w2p = w2p.reshape(k * k * c2p, c2p).astype(jnp.bfloat16)
        self.w3p = jnp.pad(w3f, ((0, c2p - out_channels),
                                 (0, c1p - in_channels))).astype(jnp.bfloat16)
        self.b1p = jnp.pad(b1, (0, c2p - out_channels)).reshape(1, c2p)
        self.b2p = jnp.pad(b2, (0, c2p - out_channels)).reshape(1, c2p)
        self.b3p = jnp.pad(b3, (0, c1p - in_channels)).reshape(1, c1p)

        # f32 copies of the bf16 folded weights for the pure-JAX reference.
        self.ref = dict(
            w1=self.w1p[:in_channels, :out_channels].astype(jnp.float32),
            w2=w2p[:, :, :out_channels, :out_channels]
                .astype(jnp.bfloat16).astype(jnp.float32),
            w3=self.w3p[:out_channels, :in_channels].astype(jnp.float32),
            b1=b1, b2=b2, b3=b3)

        self._fwd = jax.jit(self._forward)

    def _forward(self, x_nchw):
        n, c, h, w = x_nchw.shape
        assert c == self.cin
        k, p = self.kernel, self.kernel // 2
        c1p, c2p = self.c1p, self.c2p
        hp, wp = h + 2 * p, w + 2 * p
        rows = hp * wp                          # flattened padded spatial grid
        rows_out = _round_up(rows, 8)           # sublane-aligned output rows
        guard = p * wp + p                      # largest |row shift| of a tap
        rows_g = _round_up(rows_out + 2 * guard, 8)

        # NCHW -> NHWC, zero 'same' halo, flatten spatial, add guard rows,
        # pad channels to a lane-dense multiple of 128, cast to bf16 for MXU.
        x = jnp.transpose(x_nchw, (0, 2, 3, 1))
        x = jnp.pad(x, ((0, 0), (p, p), (p, p), (0, 0))).reshape(n, rows, c)
        x = jnp.pad(x, ((0, 0), (guard, rows_g - guard - rows),
                        (0, c1p - c))).astype(jnp.bfloat16)

        # 1.0 on real pixels, 0.0 on halo/guard rows (keeps conv padding = 0).
        mask = jnp.pad(jnp.ones((h, w), jnp.float32),
                       ((p, p), (p, p))).reshape(rows)
        mask = jnp.pad(mask, (guard, rows_g - guard - rows)).reshape(rows_g, 1)

        tap_offsets = tuple(guard + (a - p) * wp + (b - p)
                            for a in range(k) for b in range(k))

        kern = functools.partial(_bottleneck_kernel, tap_offsets=tap_offsets,
                                 rows_out=rows_out, guard=guard, c2p=c2p)

        grid_spec = pltpu.PrefetchScalarGridSpec(
            num_scalar_prefetch=0,
            grid=(n,),                               # >=2 steps -> both v7x TCs
            in_specs=[
                pl.BlockSpec((None, rows_g, c1p), lambda i: (i, 0, 0)),  # x
                pl.BlockSpec((rows_g, 1), lambda i: (0, 0)),             # mask
                pl.BlockSpec((c1p, c2p), lambda i: (0, 0)),              # w1
                pl.BlockSpec((1, c2p), lambda i: (0, 0)),                # b1
                pl.BlockSpec((k * k * c2p, c2p), lambda i: (0, 0)),      # w2
                pl.BlockSpec((1, c2p), lambda i: (0, 0)),                # b2
                pl.BlockSpec((c2p, c1p), lambda i: (0, 0)),              # w3
                pl.BlockSpec((1, c1p), lambda i: (0, 0)),                # b3
            ],
            out_specs=pl.BlockSpec((None, rows_out, c1p),
                                   lambda i: (i, 0, 0)),
            scratch_shapes=[pltpu.VMEM((rows_g, c2p), jnp.bfloat16)],
        )

        y = pl.pallas_call(
            kern,
            out_shape=jax.ShapeDtypeStruct((n, rows_out, c1p), jnp.float32),
            grid_spec=grid_spec,
            compiler_params=pltpu.CompilerParams(
                dimension_semantics=("parallel",),
                vmem_limit_bytes=32 * 1024 * 1024),   # safe on v5e/v6e/v7x
        )(x, mask, self.w1p, self.b1p, self.w2p, self.b2p,
          self.w3p, self.b3p)

        # Drop guard/halo rows and channel padding; back to NCHW f32.
        y = y[:, :rows, :c].reshape(n, hp, wp, c)[:, p:p + h, p:p + w, :]
        return jnp.transpose(y, (0, 3, 1, 2))

    def __call__(self, x_nchw):
        return self._fwd(x_nchw)


# ---------------------------------------------------------------------------
# Pure-JAX reference (same bf16-rounded operands as the kernel)
# ---------------------------------------------------------------------------
def reference_forward(block, x_nchw):
    n, c, h, w = x_nchw.shape
    k, p = block.kernel, block.kernel // 2
    prm = block.ref
    xb = jnp.transpose(x_nchw, (0, 2, 3, 1)).astype(jnp.bfloat16) \
            .astype(jnp.float32)
    h1 = jnp.maximum(xb @ prm['w1'] + prm['b1'], 0.0)
    h1 = h1.astype(jnp.bfloat16).astype(jnp.float32)
    h1p = jnp.pad(h1, ((0, 0), (p, p), (p, p), (0, 0)))
    h2 = 0.0
    for a in range(k):
        for b in range(k):
            h2 = h2 + h1p[:, a:a + h, b:b + w, :] @ prm['w2'][a, b]
    h2 = jnp.maximum(h2 + prm['b2'], 0.0)
    h2 = h2.astype(jnp.bfloat16).astype(jnp.float32)
    y = jnp.maximum(h2 @ prm['w3'] + prm['b3'] + xb, 0.0)
    return jnp.transpose(y, (0, 3, 1, 2))


if __name__ == "__main__":
    key = jax.random.PRNGKey(0)
    k_param, k_x = jax.random.split(key)

    batch, in_channels, out_channels, kernel, spatial = 2, 16, 8, 3, 8
    block = BottleneckPallas(kernel, in_channels, out_channels, k_param)

    x = jax.random.normal(
        k_x, (batch, in_channels, spatial, spatial), jnp.float32)

    y = jax.block_until_ready(block(x))
    assert y.shape == x.shape and y.dtype == jnp.float32

    y_ref = jax.block_until_ready(reference_forward(block, x))
    err = float(jnp.max(jnp.abs(y - y_ref)))
    assert err < 2e-2, f"max abs err {err}"

    print("KERNEL_OK")
</pallas_src>

<mosaic_0001>
module attributes {stable_mosaic.version = 11 : i64} {
  func.func @_bottleneck_kernel(%arg0: i32, %arg1: memref<1x128x128xbf16, #tpu.memory_space<vmem>>, %arg2: memref<128x1xf32, #tpu.memory_space<vmem>>, %arg3: memref<128x128xbf16, #tpu.memory_space<vmem>>, %arg4: memref<1x128xf32, #tpu.memory_space<vmem>>, %arg5: memref<1152x128xbf16, #tpu.memory_space<vmem>>, %arg6: memref<1x128xf32, #tpu.memory_space<vmem>>, %arg7: memref<128x128xbf16, #tpu.memory_space<vmem>>, %arg8: memref<1x128xf32, #tpu.memory_space<vmem>>, %arg9: memref<1x104x128xf32, #tpu.memory_space<vmem>>, %arg10: memref<128x128xbf16, #tpu.memory_space<vmem>>) attributes {dimension_semantics = [#tpu.dimension_semantics<parallel>], iteration_bounds = array<i64: 2>, scalar_prefetch = 0 : i64, scratch_operands = 1 : i64, tpu.core_type = #tpu.core_type<tc>, window_params = [{transform_indices = @transform_0, window_bounds = array<i64: 1, 128, 128>}, {pipeline_mode = #tpu.pipeline_mode<synchronous>, transform_indices = @transform_1, window_bounds = array<i64: 128, 1>}, {pipeline_mode = #tpu.pipeline_mode<synchronous>, transform_indices = @transform_2, window_bounds = array<i64: 128, 128>}, {pipeline_mode = #tpu.pipeline_mode<synchronous>, transform_indices = @transform_3, window_bounds = array<i64: 1, 128>}, {pipeline_mode = #tpu.pipeline_mode<synchronous>, transform_indices = @transform_4, window_bounds = array<i64: 1152, 128>}, {pipeline_mode = #tpu.pipeline_mode<synchronous>, transform_indices = @transform_5, window_bounds = array<i64: 1, 128>}, {pipeline_mode = #tpu.pipeline_mode<synchronous>, transform_indices = @transform_6, window_bounds = array<i64: 128, 128>}, {pipeline_mode = #tpu.pipeline_mode<synchronous>, transform_indices = @transform_7, window_bounds = array<i64: 1, 128>}, {transform_indices = @transform_8, window_bounds = array<i64: 1, 104, 128>}]} {
    %c0 = arith.constant 0 : index
    %c0_0 = arith.constant 0 : index
    %c0_1 = arith.constant 0 : index
    %0 = vector.load %arg1[%c0, %c0_0, %c0_1] : memref<1x128x128xbf16, #tpu.memory_space<vmem>>, vector<1x128x128xbf16>
    %1 = vector.shape_cast %0 : vector<1x128x128xbf16> to vector<128x128xbf16>
    %c0_2 = arith.constant 0 : index
    %c0_3 = arith.constant 0 : index
    %2 = vector.load %arg3[%c0_2, %c0_3] : memref<128x128xbf16, #tpu.memory_space<vmem>>, vector<128x128xbf16>
    %cst = arith.constant dense<0.000000e+00> : vector<128x128xf32>
    %3 = tpu.matmul %1, %2, %cst {dimension_numbers = #tpu.dot_dimension_numbers<[1], [0], [0], [1], [0, 0, 1, 1], [], []>} : vector<128x128xbf16>, vector<128x128xbf16>, vector<128x128xf32> -> vector<128x128xf32>
    %c0_4 = arith.constant 0 : index
    %c0_5 = arith.constant 0 : index
    %4 = vector.load %arg4[%c0_4, %c0_5] : memref<1x128xf32, #tpu.memory_space<vmem>>, vector<1x128xf32>
    %5 = vector.broadcast %4 : vector<1x128xf32> to vector<128x128xf32>
    %6 = arith.addf %3, %5 : vector<128x128xf32>
    %cst_6 = arith.constant 0.000000e+00 : f32
    %7 = vector.broadcast %cst_6 : f32 to vector<128x128xf32>
    %8 = arith.maximumf %6, %7 : vector<128x128xf32>
    %c0_7 = arith.constant 0 : index
    %c0_8 = arith.constant 0 : index
    %9 = vector.load %arg2[%c0_7, %c0_8] : memref<128x1xf32, #tpu.memory_space<vmem>>, vector<128x1xf32>
    %10 = vector.broadcast %9 : vector<128x1xf32> to vector<128x128xf32>
    %11 = arith.mulf %8, %10 : vector<128x128xf32>
    %12 = arith.truncf %11 : vector<128x128xf32> to vector<128x128xbf16>
    %c0_9 = arith.constant 0 : index
    %c0_10 = arith.constant 0 : index
    %13 = vector.load %arg10[%c0_9, %c0_10] : memref<128x128xbf16, #tpu.memory_space<vmem>>, vector<128x128xbf16>
    tpu.vector_store %arg10[%c0_9, %c0_10], %12 {strides = array<i32>} : memref<128x128xbf16, #tpu.memory_space<vmem>>, vector<128x128xbf16>,
    %c0_11 = arith.constant 0 : index
    %c0_12 = arith.constant 0 : index
    %14 = vector.load %arg10[%c0_11, %c0_12] : memref<128x128xbf16, #tpu.memory_space<vmem>>, vector<104x128xbf16>
    %c0_13 = arith.constant 0 : index
    %c0_14 = arith.constant 0 : index
    %15 = vector.load %arg5[%c0_13, %c0_14] : memref<1152x128xbf16, #tpu.memory_space<vmem>>, vector<128x128xbf16>
    %cst_15 = arith.constant dense<0.000000e+00> : vector<104x128xf32>
    %16 = tpu.matmul %14, %15, %cst_15 {dimension_numbers = #tpu.dot_dimension_numbers<[1], [0], [0], [1], [0, 0, 1, 1], [], []>} : vector<104x128xbf16>, vector<128x128xbf16>, vector<104x128xf32> -> vector<104x128xf32>
    %c1 = arith.constant 1 : index
    %c0_16 = arith.constant 0 : index
    %17 = vector.load %arg10[%c1, %c0_16] : memref<128x128xbf16, #tpu.memory_space<vmem>>, vector<104x128xbf16>
    %c128 = arith.constant 128 : index
    %c0_17 = arith.constant 0 : index
    %18 = vector.load %arg5[%c128, %c0_17] : memref<1152x128xbf16, #tpu.memory_space<vmem>>, vector<128x128xbf16>
    %cst_18 = arith.constant dense<0.000000e+00> : vector<104x128xf32>
    %19 = tpu.matmul %17, %18, %cst_18 {dimension_numbers = #tpu.dot_dimension_numbers<[1], [0], [0], [1], [0, 0, 1, 1], [], []>} : vector<104x128xbf16>, vector<128x128xbf16>, vector<104x128xf32> -> vector<104x128xf32>
    %20 = arith.addf %16, %19 : vector<104x128xf32>
    %c2 = arith.constant 2 : index
    %c0_19 = arith.constant 0 : index
    %21 = vector.load %arg10[%c2, %c0_19] : memref<128x128xbf16, #tpu.memory_space<vmem>>, vector<104x128xbf16>
    %c256 = arith.constant 256 : index
    %c0_20 = arith.constant 0 : index
    %22 = vector.load %arg5[%c256, %c0_20] : memref<1152x128xbf16, #tpu.memory_space<vmem>>, vector<128x128xbf16>
    %cst_21 = arith.constant dense<0.000000e+00> : vector<104x128xf32>
    %23 = tpu.matmul %21, %22, %cst_21 {dimension_numbers = #tpu.dot_dimension_numbers<[1], [0], [0], [1], [0, 0, 1, 1], [], []>} : vector<104x128xbf16>, vector<128x128xbf16>, vector<104x128xf32> -> vector<104x128xf32>
    %24 = arith.addf %20, %23 : vector<104x128xf32>
    %c10 = arith.constant 10 : index
    %c0_22 = arith.constant 0 : index
    %25 = vector.load %arg10[%c10, %c0_22] : memref<128x128xbf16, #tpu.memory_space<vmem>>, vector<104x128xbf16>
    %c384 = arith.constant 384 : index
    %c0_23 = arith.constant 0 : index
    %26 = vector.load %arg5[%c384, %c0_23] : memref<1152x128xbf16, #tpu.memory_space<vmem>>, vector<128x128xbf16>
    %cst_24 = arith.constant dense<0.000000e+00> : vector<104x128xf32>
    %27 = tpu.matmul %25, %26, %cst_24 {dimension_numbers = #tpu.dot_dimension_numbers<[1], [0], [0], [1], [0, 0, 1, 1], [], []>} : vector<104x128xbf16>, vector<128x128xbf16>, vector<104x128xf32> -> vector<104x128xf32>
    %28 = arith.addf %24, %27 : vector<104x128xf32>
    %c11 = arith.constant 11 : index
    %c0_25 = arith.constant 0 : index
    %29 = vector.load %arg10[%c11, %c0_25] : memref<128x128xbf16, #tpu.memory_space<vmem>>, vector<104x128xbf16>
    %c512 = arith.constant 512 : index
    %c0_26 = arith.constant 0 : index
    %30 = vector.load %arg5[%c512, %c0_26] : memref<1152x128xbf16, #tpu.memory_space<vmem>>, vector<128x128xbf16>
    %cst_27 = arith.constant dense<0.000000e+00> : vector<104x128xf32>
    %31 = tpu.matmul %29, %30, %cst_27 {dimension_numbers = #tpu.dot_dimension_numbers<[1], [0], [0], [1], [0, 0, 1, 1], [], []>} : vector<104x128xbf16>, vector<128x128xbf16>, vector<104x128xf32> -> vector<104x128xf32>
    %32 = arith.addf %28, %31 : vector<104x128xf32>
    %c12 = arith.constant 12 : index
    %c0_28 = arith.constant 0 : index
    %33 = vector.load %arg10[%c12, %c0_28] : memref<128x128xbf16, #tpu.memory_space<vmem>>, vector<104x128xbf16>
    %c640 = arith.constant 640 : index
    %c0_29 = arith.constant 0 : index
    %34 = vector.load %arg5[%c640, %c0_29] : memref<1152x128xbf16, #tpu.memory_space<vmem>>, vector<128x128xbf16>
    %cst_30 = arith.constant dense<0.000000e+00> : vector<104x128xf32>
    %35 = tpu.matmul %33, %34, %cst_30 {dimension_numbers = #tpu.dot_dimension_numbers<[1], [0], [0], [1], [0, 0, 1, 1], [], []>} : vector<104x128xbf16>, vector<128x128xbf16>, vector<104x128xf32> -> vector<104x128xf32>
    %36 = arith.addf %32, %35 : vector<104x128xf32>
    %c20 = arith.constant 20 : index
    %c0_31 = arith.constant 0 : index
    %37 = vector.load %arg10[%c20, %c0_31] : memref<128x128xbf16, #tpu.memory_space<vmem>>, vector<104x128xbf16>
    %c768 = arith.constant 768 : index
    %c0_32 = arith.constant 0 : index
    %38 = vector.load %arg5[%c768, %c0_32] : memref<1152x128xbf16, #tpu.memory_space<vmem>>, vector<128x128xbf16>
    %cst_33 = arith.constant dense<0.000000e+00> : vector<104x128xf32>
    %39 = tpu.matmul %37, %38, %cst_33 {dimension_numbers = #tpu.dot_dimension_numbers<[1], [0], [0], [1], [0, 0, 1, 1], [], []>} : vector<104x128xbf16>, vector<128x128xbf16>, vector<104x128xf32> -> vector<104x128xf32>
    %40 = arith.addf %36, %39 : vector<104x128xf32>
    %c21 = arith.constant 21 : index
    %c0_34 = arith.constant 0 : index
    %41 = vector.load %arg10[%c21, %c0_34] : memref<128x128xbf16, #tpu.memory_space<vmem>>, vector<104x128xbf16>
    %c896 = arith.constant 896 : index
    %c0_35 = arith.constant 0 : index
    %42 = vector.load %arg5[%c896, %c0_35] : memref<1152x128xbf16, #tpu.memory_space<vmem>>, vector<128x128xbf16>
    %cst_36 = arith.constant dense<0.000000e+00> : vector<104x128xf32>
    %43 = tpu.matmul %41, %42, %cst_36 {dimension_numbers = #tpu.dot_dimension_numbers<[1], [0], [0], [1], [0, 0, 1, 1], [], []>} : vector<104x128xbf16>, vector<128x128xbf16>, vector<104x128xf32> -> vector<104x128xf32>
    %44 = arith.addf %40, %43 : vector<104x128xf32>
    %c22 = arith.constant 22 : index
    %c0_37 = arith.constant 0 : index
    %45 = vector.load %arg10[%c22, %c0_37] : memref<128x128xbf16, #tpu.memory_space<vmem>>, vector<104x128xbf16>
    %c1024 = arith.constant 1024 : index
    %c0_38 = arith.constant 0 : index
    %46 = vector.load %arg5[%c1024, %c0_38] : memref<1152x128xbf16, #tpu.memory_space<vmem>>, vector<128x128xbf16>
    %cst_39 = arith.constant dense<0.000000e+00> : vector<104x128xf32>
    %47 = tpu.matmul %45, %46, %cst_39 {dimension_numbers = #tpu.dot_dimension_numbers<[1], [0], [0], [1], [0, 0, 1, 1], [], []>} : vector<104x128xbf16>, vector<128x128xbf16>, vector<104x128xf32> -> vector<104x128xf32>
    %48 = arith.addf %44, %47 : vector<104x128xf32>
    %c0_40 = arith.constant 0 : index
    %c0_41 = arith.constant 0 : index
    %49 = vector.load %arg6[%c0_40, %c0_41] : memref<1x128xf32, #tpu.memory_space<vmem>>, vector<1x128xf32>
    %50 = vector.broadcast %49 : vector<1x128xf32> to vector<104x128xf32>
    %51 = arith.addf %48, %50 : vector<104x128xf32>
    %cst_42 = arith.constant 0.000000e+00 : f32
    %52 = vector.broadcast %cst_42 : f32 to vector<104x128xf32>
    %53 = arith.maximumf %51, %52 : vector<104x128xf32>
    %54 = arith.truncf %53 : vector<104x128xf32> to vector<104x128xbf16>
    %c0_43 = arith.constant 0 : index
    %c11_44 = arith.constant 11 : index
    %c0_45 = arith.constant 0 : index
    %55 = vector.load %arg1[%c0_43, %c11_44, %c0_45] : memref<1x128x128xbf16, #tpu.memory_space<vmem>>, vector<1x104x128xbf16>
    %56 = vector.shape_cast %55 : vector<1x104x128xbf16> to vector<104x128xbf16>
    %57 = arith.extf %56 : vector<104x128xbf16> to vector<104x128xf32>
    %c0_46 = arith.constant 0 : index
    %c0_47 = arith.constant 0 : index
    %58 = vector.load %arg7[%c0_46, %c0_47] : memref<128x128xbf16, #tpu.memory_space<vmem>>, vector<128x128xbf16>
    %cst_48 = arith.constant dense<0.000000e+00> : vector<104x128xf32>
    %59 = tpu.matmul %54, %58, %cst_48 {dimension_numbers = #tpu.dot_dimension_numbers<[1], [0], [0], [1], [0, 0, 1, 1], [], []>} : vector<104x128xbf16>, vector<128x128xbf16>, vector<104x128xf32> -> vector<104x128xf32>
    %c0_49 = arith.constant 0 : index
    %c0_50 = arith.constant 0 : index
    %60 = vector.load %arg8[%c0_49, %c0_50] : memref<1x128xf32, #tpu.memory_space<vmem>>, vector<1x128xf32>
    %61 = vector.broadcast %60 : vector<1x128xf32> to vector<104x128xf32>
    %62 = arith.addf %59, %61 : vector<104x128xf32>
    %63 = arith.addf %62, %57 : vector<104x128xf32>
    %cst_51 = arith.constant 0.000000e+00 : f32
    %64 = vector.broadcast %cst_51 : f32 to vector<104x128xf32>
    %65 = arith.maximumf %63, %64 : vector<104x128xf32>
    %c0_52 = arith.constant 0 : index
    %c0_53 = arith.constant 0 : index
    %c0_54 = arith.constant 0 : index
    %66 = vector.load %arg9[%c0_52, %c0_53, %c0_54] : memref<1x104x128xf32, #tpu.memory_space<vmem>>, vector<1x104x128xf32>
    %67 = vector.shape_cast %66 : vector<1x104x128xf32> to vector<104x128xf32>
    %68 = vector.shape_cast %65 : vector<104x128xf32> to vector<1x104x128xf32>
    tpu.vector_store %arg9[%c0_52, %c0_53, %c0_54], %68 {strides = array<i32>} : memref<1x104x128xf32, #tpu.memory_space<vmem>>, vector<1x104x128xf32>,
    return
  }
  func.func @transform_0(%arg0: i32) -> (i32, i32, i32) {
    %c0_i32 = arith.constant 0 : i32
    %c0_i32_0 = arith.constant 0 : i32
    %c0_i32_1 = arith.constant 0 : i32
    return %arg0, %c0_i32, %c0_i32_0 : i32, i32, i32
  }
  func.func @transform_1(%arg0: i32) -> (i32, i32) {
    %c0_i32 = arith.constant 0 : i32
    %c0_i32_0 = arith.constant 0 : i32
    %c0_i32_1 = arith.constant 0 : i32
    return %c0_i32, %c0_i32_0 : i32, i32
  }
  func.func @transform_2(%arg0: i32) -> (i32, i32) {
    %c0_i32 = arith.constant 0 : i32
    %c0_i32_0 = arith.constant 0 : i32
    %c0_i32_1 = arith.constant 0 : i32
    return %c0_i32, %c0_i32_0 : i32, i32
  }
  func.func @transform_3(%arg0: i32) -> (i32, i32) {
    %c0_i32 = arith.constant 0 : i32
    %c0_i32_0 = arith.constant 0 : i32
    %c0_i32_1 = arith.constant 0 : i32
    return %c0_i32, %c0_i32_0 : i32, i32
  }
  func.func @transform_4(%arg0: i32) -> (i32, i32) {
    %c0_i32 = arith.constant 0 : i32
    %c0_i32_0 = arith.constant 0 : i32
    %c0_i32_1 = arith.constant 0 : i32
    return %c0_i32, %c0_i32_0 : i32, i32
  }
  func.func @transform_5(%arg0: i32) -> (i32, i32) {
    %c0_i32 = arith.constant 0 : i32
    %c0_i32_0 = arith.constant 0 : i32
    %c0_i32_1 = arith.constant 0 : i32
    return %c0_i32, %c0_i32_0 : i32, i32
  }
  func.func @transform_6(%arg0: i32) -> (i32, i32) {
    %c0_i32 = arith.constant 0 : i32
    %c0_i32_0 = arith.constant 0 : i32
    %c0_i32_1 = arith.constant 0 : i32
    return %c0_i32, %c0_i32_0 : i32, i32
  }
  func.func @transform_7(%arg0: i32) -> (i32, i32) {
    %c0_i32 = arith.constant 0 : i32
    %c0_i32_0 = arith.constant 0 : i32
    %c0_i32_1 = arith.constant 0 : i32
    return %c0_i32, %c0_i32_0 : i32, i32
  }
  func.func @transform_8(%arg0: i32) -> (i32, i32, i32) {
    %c0_i32 = arith.constant 0 : i32
    %c0_i32_0 = arith.constant 0 : i32
    %c0_i32_1 = arith.constant 0 : i32
    return %arg0, %c0_i32, %c0_i32_0 : i32, i32, i32
  }
}

</mosaic_0001>

<bundles_post_ra>
// kernel: _forward.1
= control target key start
LH: loop header
LB: loop body
LE: loop exit
PB: predicated region body
PF: predicated region fallthrough
CT: control target
= control target key end

     0   :  { %s3251_s27 = smov 0   ;;  %s4061_s0 = inlined_call_operand.vmem [shape: bf16[2,128,128], index: 0, kind: input, shape index: {}]   ;;  %s4062_s1 = inlined_call_operand.vmem [shape: f32[128,1], index: 1, kind: input, shape index: {}]   ;;  %s4063_s2 = inlined_call_operand.vmem [shape: bf16[128,128], index: 2, kind: input, shape index: {}]   ;;  %s4064_s3 = inlined_call_operand.vmem [shape: f32[1,128], index: 3, kind: input, shape index: {}]   ;;  %s4065_s4 = inlined_call_operand.vmem [shape: bf16[1152,128], index: 4, kind: input, shape index: {}]   ;;  %s4066_s5 = inlined_call_operand.vmem [shape: f32[1,128], index: 5, kind: input, shape index: {}]   ;;  %s4067_s6 = inlined_call_operand.vmem [shape: bf16[128,128], index: 6, kind: input, shape index: {}]   ;;  %s4068_s7 = inlined_call_operand.vmem [shape: f32[1,128], index: 7, kind: input, shape index: {}]   ;;  %s4069_s8 = inlined_call_operand.vmem [shape: f32[2,104,128], index: 8, kind: output, shape index: {}]  }
   0x1 LB: > { %s2507_s28 = sadd.s32 4294967295, %s3203_s27   ;;  %p2511_p0 = scmp.ge.s32.totalorder %s3203_s27, 1  ;;  %s3203_s27 = sphi %s3251_s27, %s18_s27  }
   0x2   : > { %p262_p1 = scmp.lt.s32.totalorder %s3203_s27, 3 }
   0x4   : > { %p263_p2 = pnand %p2511_p0, %p262_p1 }
   0x5   : > { %p296_p3 = scmp.lt.s32.totalorder (!%p263_p2), %s2507_s28, 1 }
   0x6   : > { %266 = sbr.rel (%p263_p2) target bundleno = 838 (0x346), region = 52 }
   0xb   : > { %v2977_v0 = vld [vmem:[%s4063_s2 + $0x38] sm:$0xff]  ;;  %v2976_v1 = vld [vmem:[%s4063_s2 + $0x30] sm:$0xff]  ;;  %v3205_v2 = vmov 0   ;;  %v503_v3 = vld [vmem:[%s4062_s1] sm:$0xff]  ;;  %s4071_s28 = smov (!%p296_p3, %s2507_s28), 1  ;;  %vm1001_vm0 = vcmask 1046528  }
   0xc   : > { %438 = vmatpush.bf16.msra.mxu0 %v2977_v0  ;;  %3191 = vset.pattern.permute.xlu0 %v3205_v2  ;;  %v2975_v4 = vld [vmem:[%s4063_s2 + $0x28] sm:$0xff]  ;;  %v2974_v5 = vld [vmem:[%s4063_s2 + $0x20] sm:$0xff]  ;;  %v2973_v6 = vld [vmem:[%s4063_s2 + $0x18] sm:$0xff]  ;;  %s2961_s29 = sshll.u32 %s4071_s28, 6  ;;  %vm728_vm1 = vsmask.f32 7424 }
   0xd   : > { %521 = vperm.xlu0 %3191, %v503_v3   ;;  %3192 = vset.pattern.permute.xlu1 %v3205_v2  ;;  %v504_v7 = vld [vmem:[%s4062_s1 + $0x8] sm:$0xff]  ;;  %v505_v8 = vld [vmem:[%s4062_s1 + $0x10] sm:$0xff]  ;;  %v2970_v11 = vld [vmem:[%s4063_s2] sm:$0xff]  ;;  %s3298_s12 = scalar_lea.vmem %s4061_s0, %s2961_s29  ;;  %vm2057_vm2 = vcmask 1044480   ;;  %vm1863_vm3 = vsmask.f32 5376 }
   0xe   : > { %3193 = vset.pattern.permute.xlu2 %v3205_v2  ;;  %v2972_v9 = vld [vmem:[%s4063_s2 + $0x10] sm:$0xff]  ;;  %531 = vperm.xlu1 %3192, %v505_v8   ;;  %v2971_v10 = vld [vmem:[%s4063_s2 + $0x8] sm:$0xff]  ;;  %v2962_v12 = vld [vmem:[%s3298_s12] sm:$0xff]  ;;  %vm1529_vm4 = vcmask 1045504   ;;  %vm1335_vm5 = vsmask.f32 6400 }
   0xf   : > { %v506_v13 = vld [vmem:[%s4062_s1 + $0x18] sm:$0xff]  ;;  %v513_v14 = vld [vmem:[%s4062_s1 + $0x50] sm:$0xff]  ;;  %v2963_v15 = vld [vmem:[%s3298_s12 + $0x8] sm:$0xff]  ;;  %s3181_s15 = smul.u32 104, %s4071_s28 }
  0x10   : > { %439 = vmatpush.bf16.msra.mxu0 %v2976_v1  ;;  %v516_v16 = vld [vmem:[%s4062_s1 + $0x68] sm:$0xff]  ;;  %v514_v17 = vld [vmem:[%s4062_s1 + $0x58] sm:$0xff]  ;;  %v511_v18 = vld [vmem:[%s4062_s1 + $0x40] sm:$0xff] }
  0x11   : > { %v509_v19 = vld [vmem:[%s4062_s1 + $0x30] sm:$0xff]  ;;  %v518_v21 = vld [vmem:[%s4062_s1 + $0x78] sm:$0xff]  ;;  %v507_v22 = vld [vmem:[%s4062_s1 + $0x20] sm:$0xff]  ;;  %s4011_s18 = scalar_lea.vmem %s4069_s8, %s3181_s15 }
  0x12   : > { %v2964_v20 = vld [vmem:[%s3298_s12 + $0x10] sm:$0xff]  ;;  %541 = vperm.xlu2 %3193, %v507_v22   ;;  %v508_v23 = vld [vmem:[%s4062_s1 + $0x28] sm:$0xff]  ;;  %v2965_v24 = vld [vmem:[%s3298_s12 + $0x18] sm:$0xff] }
  0x13   : > { %v512_v25 = vld [vmem:[%s4062_s1 + $0x48] sm:$0xff]  ;;  %v515_v26 = vld [vmem:[%s4062_s1 + $0x60] sm:$0xff]  ;;  %v510_v27 = vld [vmem:[%s4062_s1 + $0x38] sm:$0xff] }
  0x14   : > { %440 = vmatpush.bf16.msra.mxu0 %v2975_v4  ;;  %v2966_v28 = vld [vmem:[%s3298_s12 + $0x20] sm:$0xff]  ;;  %v2967_v29 = vld [vmem:[%s3298_s12 + $0x28] sm:$0xff]  ;;  %v2990_v30 = vld [vmem:[%s4065_s4 + $0x38] sm:$0xff] }
  0x15   : > { %526 = vperm.xlu0 %3191, %v504_v7   ;;  %938 = vmatpush.bf16.msra.mxu2 %v2990_v30  ;;  %v517_v31 = vld [vmem:[%s4062_s1 + $0x70] sm:$0xff]  ;;  %v2988_v33 = vld [vmem:[%s4065_s4 + $0x28] sm:$0xff]  ;;  %v2987_v34 = vld [vmem:[%s4065_s4 + $0x20] sm:$0xff] }
  0x16   : > { %536 = vperm.xlu1 %3192, %v506_v13   ;;  %v2989_v32 = vld [vmem:[%s4065_s4 + $0x30] sm:$0xff]  ;;  %v2986_v36 = vld [vmem:[%s4065_s4 + $0x18] sm:$0xff]  ;;  %v2984_v38 = vld [vmem:[%s4065_s4 + $0x8] sm:$0xff] }
  0x17   : > { %v2968_v35 = vld [vmem:[%s3298_s12 + $0x30] sm:$0xff]  ;;  %v3006_v39 = vld [vmem:[%s4065_s4 + $0xb8] sm:$0xff]  ;;  %v2983_v40 = vld [vmem:[%s4065_s4] sm:$0xff] }
  0x18   : > { %441 = vmatpush.bf16.msra.mxu0 %v2974_v5  ;;  %v2985_v37 = vld [vmem:[%s4065_s4 + $0x10] sm:$0xff]  ;;  %1070 = vmatpush.bf16.msra.mxu3 %v3006_v39  ;;  %v2998_v41 = vld [vmem:[%s4065_s4 + $0x78] sm:$0xff]  ;;  %v3004_v45 = vld [vmem:[%s4065_s4 + $0xa8] sm:$0xff] }
  0x19   : > { %939 = vmatpush.bf16.msra.mxu2 %v2989_v32  ;;  %v2969_v42 = vld [vmem:[%s3298_s12 + $0x38] sm:$0xff]  ;;  %v3005_v43 = vld [vmem:[%s4065_s4 + $0xb0] sm:$0xff]  ;;  %3157 = vmatpush.bf16.msra.mxu1 %v2998_v41  ;;  %v2996_v46 = vld [vmem:[%s4065_s4 + $0x68] sm:$0xff] }
  0x1a   : > { %546 = vperm.xlu2 %3193, %v508_v23   ;;  %v2997_v44 = vld [vmem:[%s4065_s4 + $0x70] sm:$0xff]  ;;  %v3003_v47 = vld [vmem:[%s4065_s4 + $0xa0] sm:$0xff]  ;;  %v3002_v49 = vld [vmem:[%s4065_s4 + $0x98] sm:$0xff] }
  0x1b   : > { %v2995_v48 = vld [vmem:[%s4065_s4 + $0x60] sm:$0xff]  ;;  %v2994_v50 = vld [vmem:[%s4065_s4 + $0x58] sm:$0xff]  ;;  %v3001_v53 = vld [vmem:[%s4065_s4 + $0x90] sm:$0xff] }
  0x1c   : > { %442 = vmatpush.bf16.msra.mxu0 %v2973_v6  ;;  %1071 = vmatpush.bf16.msra.mxu3 %v3005_v43  ;;  %v3407_v54 = vld [vmem:[%s4064_s3] ss:$0 sm:$0xff]  ;;  %v2993_v55 = vld [vmem:[%s4065_s4 + $0x50] sm:$0xff]  ;;  %v3000_v56 = vld [vmem:[%s4065_s4 + $0x88] sm:$0xff] }
  0x1d   : > { %571 = vperm.xlu0 %3191, %v513_v14   ;;  %940 = vmatpush.bf16.msra.mxu2 %v2988_v33  ;;  %v2992_v58 = vld [vmem:[%s4065_s4 + $0x48] sm:$0xff]  ;;  %v2999_v60 = vld [vmem:[%s4065_s4 + $0x80] sm:$0xff] }
  0x1e   : > { %576 = vperm.xlu1 %3192, %v514_v17   ;;  %3158 = vmatpush.bf16.msra.mxu1 %v2997_v44  ;;  %v2991_v0 = vld [vmem:[%s4065_s4 + $0x40] sm:$0xff] }
  0x20   : > { %443 = vmatpush.bf16.msra.mxu0 %v2972_v9  ;;  %1072 = vmatpush.bf16.msra.mxu3 %v3004_v45 }
  0x21   : > { %941 = vmatpush.bf16.msra.mxu2 %v2987_v34 }
  0x22   : > { %581 = vperm.xlu2 %3193, %v515_v26   ;;  %3159 = vmatpush.bf16.msra.mxu1 %v2996_v46 }
  0x24   : > { %444 = vmatpush.bf16.msra.mxu0 %v2971_v10  ;;  %1073 = vmatpush.bf16.msra.mxu3 %v3003_v47 }
  0x25   : > { %586 = vperm.xlu0 %3191, %v516_v16   ;;  %942 = vmatpush.bf16.msra.mxu2 %v2986_v36 }
  0x26   : > { %551 = vperm.xlu1 %3192, %v509_v19   ;;  %3160 = vmatpush.bf16.msra.mxu1 %v2995_v48 }
  0x28   : > { %445 = vmatpush.bf16.msra.mxu0 %v2970_v11  ;;  %1074 = vmatpush.bf16.msra.mxu3 %v3002_v49 }
  0x29   : > { %943 = vmatpush.bf16.msra.mxu2 %v2985_v37 }
  0x2a   : > { %556 = vperm.xlu2 %3193, %v510_v27   ;;  %3161 = vmatpush.bf16.msra.mxu1 %v2994_v50 }
  0x2b   : > { %446 = vmatmul.bf16.vlgmr.msra.gmra.mxu0 %v2962_v12 }
  0x2c   : > { %839 = vmatpush.bf16.msrb.mxu0 %v2998_v41  ;;  %1075 = vmatpush.bf16.msra.mxu3 %v3001_v53 }
  0x2d   : > { %561 = vperm.xlu0 %3191, %v511_v18   ;;  %944 = vmatpush.bf16.msra.mxu2 %v2984_v38 }
  0x2e   : > { %566 = vperm.xlu1 %3192, %v512_v25   ;;  %3162 = vmatpush.bf16.msra.mxu1 %v2993_v55 }
  0x30   : > { %840 = vmatpush.bf16.msrb.mxu0 %v2997_v44  ;;  %1076 = vmatpush.bf16.msra.mxu3 %v3000_v56 }
  0x31   : > { %945 = vmatpush.bf16.msra.mxu2 %v2983_v40 }
  0x32   : > { %591 = vperm.xlu2 %3193, %v517_v31   ;;  %3163 = vmatpush.bf16.msra.mxu1 %v2992_v58 }
  0x34   : > { %841 = vmatpush.bf16.msrb.mxu0 %v2996_v46  ;;  %1077 = vmatpush.bf16.msra.mxu3 %v2999_v60  ;;  %v3027_v46 = vld [vmem:[%s4065_s4 + $0x138] sm:$0xff] }
  0x35   : > { %596 = vperm.xlu0 %3191, %v518_v21   ;;  %1453 = vmatpush.bf16.msrb.mxu2 %v3027_v46 }
  0x36   : > { %3164 = vmatpush.bf16.msra.mxu1 %v2991_v0 }
  0x38   : > { %842 = vmatpush.bf16.msrb.mxu0 %v2995_v48 }
  0x3b   : > { %451 = vmatmul.bf16.gmra.mxu0 %v2963_v15 }
  0x3c   : > { %843 = vmatpush.bf16.msrb.mxu0 %v2994_v50 }
  0x40   : > { %844 = vmatpush.bf16.msrb.mxu0 %v2993_v55 }
  0x44   : > { %845 = vmatpush.bf16.msrb.mxu0 %v2992_v58 }
  0x48   : > { %846 = vmatpush.bf16.msrb.mxu0 %v2991_v0 }
  0x4b   : > { %456 = vmatmul.bf16.gmra.mxu0 %v2964_v20 }
  0x5b   : > { %461 = vmatmul.bf16.gmra.mxu0 %v2965_v24 }
  0x6b   : > { %466 = vmatmul.bf16.gmra.mxu0 %v2966_v28 }
  0x6c   : > { %v542_v13 = vpop.permute.xlu2 %541 }
  0x74   : > { %v547_v22 = vpop.permute.xlu2 %546 }
  0x7b   : > { %471 = vmatmul.bf16.gmra.mxu0 %v2967_v29 }
  0x7c   : > { %v3436_v45 = vpop.permute.xlu2 %581 }
  0x7f   : > { %v522_v52 = vpop.permute.xlu0 %521 }
  0x80   : > { %v532_v6 = vpop.permute.xlu1 %531 }
  0x87   : > { %v527_v63 = vpop.permute.xlu0 %526 }
  0x88   : > { %v537_v11 = vpop.permute.xlu1 %536 }
  0x8b   : > { %476 = vmatmul.bf16.gmra.mxu0 %v2968_v35 }
  0x8f   : > { %v3445_v53 = vpop.permute.xlu0 %571 }
  0x90   : > { %v3432_v41 = vpop.permute.xlu1 %576 }
  0x98   : > { %v552_v60 = vpop.permute.xlu1 %551 }
  0x9b   : > { %481 = vmatmul.bf16.gmra.mxu0 %v2969_v42 }
  0xa8   : > { %v447_v51 = vpop.f32.mrf.mxu0 }
  0xa9   : > { %v448_v57 = vadd.f32 %v3407_v54, %v447_v51 }
  0xab   : > { %v487_v61 = vmax.f32 %v448_v57, 0.0 }
  0xad   : > { %v599_v2 = vmul.f32 %v522_v52, %v487_v61  ;;  %v557_v61 = vpop.permute.xlu2 %556 }
  0xb0   : > { %v449_v59 = vpop.f32.mrf.mxu0 }
  0xb1   : > { %v450_v62 = vadd.f32 %v3407_v54, %v449_v59 }
  0xb3   : > { %v488_v1 = vmax.f32 %v450_v62, 0.0 }
  0xb5   : > { %v600_v3 = vmul.f32 %v527_v63, %v488_v1 }
  0xb7   : > { %v3076_v4 = vpack.c.bf16 %v600_v3, %v599_v2 }
  0xb8   : > { %v452_v5 = vpop.f32.mrf.mxu0 }
  0xb9   : > { %3077 = vst [vmem:[#allocation2] sm:$0xff] %v3076_v4   ;;  %946 = vmatmul.bf16.vlgmr.msra.gmra.mxu2 %v3076_v4  ;;  %v453_v7 = vadd.f32 %v3407_v54, %v452_v5  ;;  %v732_v20 = vshll.u32 %v3076_v4, 16  ;;  %v730_v29 = vshrl.u32 %v3076_v4, 16 }
  0xbb   : > { %v489_v9 = vmax.f32 %v453_v7, 0.0  ;;  %v734_v24 = vrot.slane %v732_v20, 1 }
  0xbd   : > { %v601_v14 = vmul.f32 %v532_v6, %v489_v9  ;;  %v735_v34 = vor.u32 %v734_v24, %v730_v29  ;;  %v3471_v24 = vpop.permute.xlu0 %586 }
  0xc0   : > { %v454_v8 = vpop.f32.mrf.mxu0  ;;  %v3148_v18 = vld [vmem:[#allocation2] sm:$0xf0]  ;;  %v3149_v19 = vld [vmem:[#allocation2] sm:$0xe] }
  0xc1   : > { %v455_v10 = vadd.f32 %v3407_v54, %v454_v8  ;;  %v3150_v23 = vor.u32 %v3149_v19, %v3148_v18 }
  0xc3   : > { %v490_v12 = vmax.f32 %v455_v10, 0.0  ;;  %v1002_v30 = vrot.slane %v3150_v23, 1 }
  0xc5   : > { %v602_v15 = vmul.f32 %v537_v11, %v490_v12  ;;  %v3048_v11 = vld [vmem:[%s4065_s4 + $0x1b8] sm:$0xff] }
  0xc6   : > { %1787 = vmatpush.bf16.msra.mxu0 %v3048_v11 }
  0xc7   : > { %v3081_v16 = vpack.c.bf16 %v602_v15, %v601_v14 }
  0xc8   : > { %v457_v17 = vpop.f32.mrf.mxu0 }
  0xc9   : > { %3141 = vst [vmem:[#allocation2 + $0x8] sm:$0xff] %v3081_v16   ;;  %v458_v21 = vadd.f32 %v3407_v54, %v457_v17 }
  0xcb   : > { %v491_v27 = vmax.f32 %v458_v21, 0.0  ;;  %v3026_v21 = vld [vmem:[%s4065_s4 + $0x130] sm:$0xff] }
  0xcc   : > { %1454 = vmatpush.bf16.msrb.mxu2 %v3026_v21 }
  0xcd   : > { %v603_v37 = vmul.f32 %v542_v13, %v491_v27 }
  0xd0   : > { %v459_v25 = vpop.f32.mrf.mxu0  ;;  %v2978_v26 = vld [vmem:[#allocation2 + $0x8] sm:$0xff] }
  0xd1   : > { %v460_v28 = vadd.f32 %v3407_v54, %v459_v25  ;;  %951 = vmatmul.bf16.gmra.mxu2 %v2978_v26  ;;  %v1003_v31 = vrot.slane %v2978_v26, 1  ;;  %v737_v32 = vshll.u32 %v2978_v26, 16  ;;  %v1654_v42 = vld [vmem:[#allocation2 + $0x8] sm:$0xc]  ;;  %v741_v59 = vshrl.u32 %v2978_v26, 16  ;;  %v3047_v25 = vld [vmem:[%s4065_s4 + $0x1b0] sm:$0xff] }
  0xd2   : > { %v3434_v43 = vld [vmem:[#allocation2 + $0x8] sm:$0xff]   ;;  %v1698_v47 = vunpack.c.l.b16 %v1654_v42  ;;  %1788 = vmatpush.bf16.msra.mxu0 %v3047_v25  ;;  %v562_v42 = vpop.permute.xlu0 %561 }
  0xd3   : > { %v492_v33 = vmax.f32 %v460_v28, 0.0  ;;  %v1004_v35 = vsel %vm1001_vm0, %v1002_v30, %v1003_v31  ;;  %v739_v36 = vrot.slane %v737_v32, 1  ;;  %v1699_v48 = vunpack.c.h.b16 %v3434_v43  ;;  %v2037_v49 = vld [vmem:[#allocation2 + $0x8] sm:$0x8] }
  0xd4   : > { %1078 = vmatmul.bf16.vlgmr.msra.gmra.mxu3 %v1004_v35  ;;  %v2055_v52 = vunpack.c.l.b16 %v2037_v49  ;;  %v3046_v30 = vld [vmem:[%s4065_s4 + $0x1a8] sm:$0xff] }
  0xd5   : > { %v604_v38 = vmul.f32 %v547_v22, %v492_v33  ;;  %v740_v39 = vsel %vm728_vm1, %v735_v34, %v739_v36  ;;  %v3443_v51 = vpack.c.b16 %v1699_v48, %v1698_v47  ;;  %v743_v6 = vor.u32 %v741_v59, %v739_v36 }
  0xd6   : > { %847 = vmatmul.bf16.vlgmr.msrb.gmra.mxu0 %v740_v39  ;;  %v2056_v2 = vpack.c.b16 %v1699_v48, %v2055_v52 }
  0xd7   : > { %v3086_v40 = vpack.c.bf16 %v604_v38, %v603_v37  ;;  %v1865_v1 = vshrl.u32 %v3443_v51, 16  ;;  %v1868_v4 = vshll.u32 %v3443_v51, 16  ;;  %1789 = vmatpush.bf16.msra.mxu0 %v3046_v30  ;;  %v3045_v38 = vld [vmem:[%s4065_s4 + $0x1a0] sm:$0xff]  ;;  %v3035_v30 = vld [vmem:[%s4065_s4 + $0x178] sm:$0xff] }
  0xd8   : > { %v462_v44 = vpop.f32.mrf.mxu0  ;;  %v2058_v14 = vrot.slane %v2056_v2, 3  ;;  %v3043_v2 = vld [vmem:[%s4065_s4 + $0x190] sm:$0xff]  ;;  %1598 = vmatpush.bf16.msrb.mxu3 %v3035_v30 }
  0xd9   : > { %3142 = vst [vmem:[#allocation2 + $0x10] sm:$0xff] %v3086_v40   ;;  %v463_v50 = vadd.f32 %v3407_v54, %v462_v44  ;;  %v1867_v13 = vrot.slane %v1865_v1, 2  ;;  %v1870_v16 = vrot.slane %v1868_v4, 3  ;;  %v567_v44 = vpop.permute.xlu1 %566 }
  0xdb   : > { %v493_v57 = vmax.f32 %v463_v50, 0.0  ;;  %v1871_v26 = vor.u32 %v1870_v16, %v1867_v13  ;;  %1790 = vmatpush.bf16.msra.mxu0 %v3045_v38  ;;  %v3021_v38 = vld [vmem:[%s4065_s4 + $0x108] sm:$0xff] }
  0xdd   : > { %v605_v8 = vmul.f32 %v552_v60, %v493_v57 }
  0xe0   : > { %v464_v55 = vpop.f32.mrf.mxu0  ;;  %v3447_v56 = vld [vmem:[#allocation2 + $0x10] sm:$0xff] }
  0xe1   : > { %v465_v58 = vadd.f32 %v3407_v54, %v464_v55  ;;  %956 = vmatmul.bf16.gmra.mxu2 %v3447_v56  ;;  %v1005_v62 = vrot.slane %v3447_v56, 1  ;;  %v745_v63 = vshll.u32 %v3447_v56, 16  ;;  %v3453_v0 = vld [vmem:[#allocation2 + $0x10] sm:$0xff]  ;;  %v749_v36 = vshrl.u32 %v3447_v56, 16  ;;  %v3044_v55 = vld [vmem:[%s4065_s4 + $0x198] sm:$0xff] }
  0xe2   : > { %v2059_v12 = vrot.slane %v3453_v0, 3  ;;  %v1873_v17 = vshrl.u32 %v3453_v0, 16  ;;  %v1876_v18 = vshll.u32 %v3453_v0, 16  ;;  %1791 = vmatpush.bf16.msra.mxu0 %v3044_v55 }
  0xe3   : > { %v494_v3 = vmax.f32 %v465_v58, 0.0  ;;  %v1006_v5 = vsel %vm1001_vm0, %v1003_v31, %v1005_v62  ;;  %v747_v7 = vrot.slane %v745_v63, 1 }
  0xe4   : > { %1083 = vmatmul.bf16.gmra.mxu3 %v1006_v5  ;;  %v3466_v20 = vsel %vm2057_vm2, %v2058_v14, %v2059_v12  ;;  %v1875_v22 = vrot.slane %v1873_v17, 2  ;;  %v1878_v23 = vrot.slane %v1876_v18, 3  ;;  %v3024_v5 = vld [vmem:[%s4065_s4 + $0x120] sm:$0xff] }
  0xe5   : > { %v606_v9 = vmul.f32 %v557_v61, %v494_v3  ;;  %v748_v10 = vsel %vm728_vm1, %v743_v6, %v747_v7  ;;  %v751_v47 = vor.u32 %v749_v36, %v747_v7  ;;  %v3042_v7 = vld [vmem:[%s4065_s4 + $0x188] sm:$0xff] }
  0xe6   : > { %852 = vmatmul.bf16.gmra.mxu0 %v748_v10  ;;  %v1879_v27 = vor.u32 %v1878_v23, %v1875_v22  ;;  %v3023_v22 = vld [vmem:[%s4065_s4 + $0x118] sm:$0xff] }
  0xe7   : > { %v3091_v15 = vpack.c.bf16 %v606_v9, %v605_v8  ;;  %1792 = vmatpush.bf16.msra.mxu0 %v3043_v2 }
  0xe8   : > { %v467_v19 = vpop.f32.mrf.mxu0  ;;  %v3478_v29 = vsel %vm1863_vm3, %v1871_v26, %v1879_v27 }
  0xe9   : > { %3143 = vst [vmem:[#allocation2 + $0x18] sm:$0xff] %v3091_v15   ;;  %v468_v28 = vadd.f32 %v3407_v54, %v467_v19  ;;  %v3041_v15 = vld [vmem:[%s4065_s4 + $0x180] sm:$0xff] }
  0xeb   : > { %v495_v33 = vmax.f32 %v468_v28, 0.0  ;;  %1793 = vmatpush.bf16.msra.mxu0 %v3042_v7  ;;  %v3016_v7 = vld [vmem:[%s4065_s4 + $0xe0] sm:$0xff] }
  0xed   : > { %v607_v49 = vmul.f32 %v562_v42, %v495_v33 }
  0xef   : > { %1794 = vmatpush.bf16.msra.mxu0 %v3041_v15 }
  0xf0   : > { %v469_v31 = vpop.f32.mrf.mxu0  ;;  %v2980_v32 = vld [vmem:[#allocation2 + $0x18] sm:$0xff] }
  0xf1   : > { %v470_v34 = vadd.f32 %v3407_v54, %v469_v31  ;;  %961 = vmatmul.bf16.gmra.mxu2 %v2980_v32  ;;  %v1007_v35 = vrot.slane %v2980_v32, 1  ;;  %v753_v37 = vshll.u32 %v2980_v32, 16  ;;  %v3488_v39 = vld [vmem:[#allocation2 + $0x18] sm:$0xff]  ;;  %v757_v13 = vshrl.u32 %v2980_v32, 16 }
  0xf2   : > { %v2061_v56 = vrot.slane %v3488_v39, 3  ;;  %v1882_v58 = vshrl.u32 %v3488_v39, 16  ;;  %v1885_v59 = vshll.u32 %v3488_v39, 16 }
  0xf3   : > { %v496_v40 = vmax.f32 %v470_v34, 0.0  ;;  %v1008_v46 = vsel %vm1001_vm0, %v1005_v62, %v1007_v35  ;;  %v755_v48 = vrot.slane %v753_v37, 1  ;;  %v3025_v62 = vld [vmem:[%s4065_s4 + $0x128] sm:$0xff]  ;;  %v3019_v34 = vld [vmem:[%s4065_s4 + $0xf8] sm:$0xff]  ;;  %v3034_v37 = vld [vmem:[%s4065_s4 + $0x170] sm:$0xff] }
  0xf4   : > { %1088 = vmatmul.bf16.gmra.mxu3 %v1008_v46  ;;  %v3499_v61 = vsel %vm2057_vm2, %v2059_v12, %v2061_v56  ;;  %v1884_v63 = vrot.slane %v1882_v58, 2  ;;  %v1887_v1 = vrot.slane %v1885_v59, 3  ;;  %1455 = vmatpush.bf16.msrb.mxu2 %v3025_v62  ;;  %v3033_v46 = vld [vmem:[%s4065_s4 + $0x168] sm:$0xff] }
  0xf5   : > { %v608_v50 = vmul.f32 %v567_v44, %v496_v40  ;;  %v756_v52 = vsel %vm728_vm1, %v751_v47, %v755_v48  ;;  %v759_v19 = vor.u32 %v757_v13, %v755_v48  ;;  %1259 = vmatpush.bf16.msrb.mxu1 %v3019_v34  ;;  %v3018_v40 = vld [vmem:[%s4065_s4 + $0xf0] sm:$0xff]  ;;  %1599 = vmatpush.bf16.msrb.mxu3 %v3034_v37  ;;  %v3017_v48 = vld [vmem:[%s4065_s4 + $0xe8] sm:$0xff] }
  0xf6   : > { %857 = vmatmul.bf16.gmra.mxu0 %v756_v52  ;;  %v1888_v3 = vor.u32 %v1887_v1, %v1884_v63 }
  0xf7   : > { %v3096_v57 = vpack.c.bf16 %v608_v50, %v607_v49  ;;  %v3020_v49 = vld [vmem:[%s4065_s4 + $0x100] sm:$0xff] }
  0xf8   : > { %v472_v60 = vpop.f32.mrf.mxu0  ;;  %v3512_v6 = vsel %vm1863_vm3, %v1879_v27, %v1888_v3  ;;  %1456 = vmatpush.bf16.msrb.mxu2 %v3024_v5 }
  0xf9   : > { %3144 = vst [vmem:[#allocation2 + $0x20] sm:$0xff] %v3096_v57   ;;  %v473_v4 = vadd.f32 %v3407_v54, %v472_v60  ;;  %1260 = vmatpush.bf16.msrb.mxu1 %v3018_v40  ;;  %1600 = vmatpush.bf16.msrb.mxu3 %v3033_v46 }
  0xfb   : > { %v497_v10 = vmax.f32 %v473_v4, 0.0 }
  0xfc   : > { %1457 = vmatpush.bf16.msrb.mxu2 %v3023_v22 }
  0xfd   : > { %v609_v23 = vmul.f32 %v3445_v53, %v497_v10  ;;  %1261 = vmatpush.bf16.msrb.mxu1 %v3017_v48  ;;  %v597_v48 = vpop.permute.xlu0 %596 }
 0x100   : > { %v474_v8 = vpop.f32.mrf.mxu0  ;;  %v3517_v9 = vld [vmem:[#allocation2 + $0x20] sm:$0xff] }
 0x101   : > { %v475_v11 = vadd.f32 %v3407_v54, %v474_v8  ;;  %966 = vmatmul.bf16.gmra.mxu2 %v3517_v9  ;;  %v1009_v12 = vrot.slane %v3517_v9, 1  ;;  %v761_v14 = vshll.u32 %v3517_v9, 16  ;;  %v3526_v16 = vld [vmem:[#allocation2 + $0x20] sm:$0xff]  ;;  %v765_v58 = vshrl.u32 %v3517_v9, 16  ;;  %1262 = vmatpush.bf16.msrb.mxu1 %v3016_v7 }
 0x102   : > { %v2063_v27 = vrot.slane %v3526_v16, 3  ;;  %v1891_v31 = vshrl.u32 %v3526_v16, 16  ;;  %v1894_v32 = vshll.u32 %v3526_v16, 16 }
 0x103   : > { %v498_v17 = vmax.f32 %v475_v11, 0.0  ;;  %v1010_v18 = vsel %vm1001_vm0, %v1007_v35, %v1009_v12  ;;  %v763_v21 = vrot.slane %v761_v14, 1 }
 0x104   : > { %1093 = vmatmul.bf16.gmra.mxu3 %v1010_v18  ;;  %v3545_v53 = vsel %vm2057_vm2, %v2061_v56, %v2063_v27  ;;  %v1893_v35 = vrot.slane %v1891_v31, 2  ;;  %v1896_v36 = vrot.slane %v1894_v32, 3  ;;  %v3030_v18 = vld [vmem:[%s4065_s4 + $0x150] sm:$0xff] }
 0x105   : > { %v610_v25 = vmul.f32 %v3432_v41, %v498_v17  ;;  %v764_v26 = vsel %vm728_vm1, %v759_v19, %v763_v21  ;;  %v3022_v41 = vld [vmem:[%s4065_s4 + $0x110] sm:$0xff]  ;;  %v767_v1 = vor.u32 %v765_v58, %v763_v21  ;;  %v3015_v17 = vld [vmem:[%s4065_s4 + $0xd8] sm:$0xff] }
 0x106   : > { %862 = vmatmul.bf16.gmra.mxu0 %v764_v26  ;;  %1458 = vmatpush.bf16.msrb.mxu2 %v3022_v41  ;;  %v1897_v42 = vor.u32 %v1896_v36, %v1893_v35  ;;  %v3014_v21 = vld [vmem:[%s4065_s4 + $0xd0] sm:$0xff]  ;;  %v1126_v26 = vld [vmem:[#allocation2 + $0x4] sm:$0xe]  ;;  %v1720_v36 = vrot.slane %v3453_v0, 2 }
 0x107   : > { %v3101_v28 = vpack.c.bf16 %v610_v25, %v609_v23  ;;  %1263 = vmatpush.bf16.msrb.mxu1 %v3015_v17  ;;  %v3029_v25 = vld [vmem:[%s4065_s4 + $0x148] sm:$0xff]  ;;  %v1170_v37 = vunpack.c.l.b16 %v1126_v26  ;;  %v3055_v0 = vld [vmem:[%s4065_s4 + $0x1f0] sm:$0xff] }
 0x108   : > { %v477_v33 = vpop.f32.mrf.mxu0  ;;  %v3564_v47 = vsel %vm1863_vm3, %v1888_v3, %v1897_v42  ;;  %v3032_v3 = vld [vmem:[%s4065_s4 + $0x160] sm:$0xff] }
 0x109   : > { %3145 = vst [vmem:[#allocation2 + $0x28] sm:$0xff] %v3101_v28   ;;  %v478_v44 = vadd.f32 %v3407_v54, %v477_v33  ;;  %1601 = vmatpush.bf16.msrb.mxu3 %v3032_v3  ;;  %v3012_v3 = vld [vmem:[%s4065_s4 + $0xc0] sm:$0xff] }
 0x10a   : > { %1459 = vmatpush.bf16.msrb.mxu2 %v3021_v38  ;;  %v1171_v38 = vunpack.c.l.b16 %v3434_v43  ;;  %v3054_v43 = vld [vmem:[%s4065_s4 + $0x1e8] sm:$0xff] }
 0x10b   : > { %v499_v55 = vmax.f32 %v478_v44, 0.0  ;;  %1264 = vmatpush.bf16.msrb.mxu1 %v3014_v21 }
 0x10c   : > { %v3660_v7 = vpack.c.b16 %v1171_v38, %v1170_v37  ;;  %v3688_v37 = vld [vmem:[#allocation2 + $0x14] sm:$0xff] }
 0x10d   : > { %v611_v4 = vmul.f32 %v3436_v45, %v499_v55  ;;  %v3642_v55 = vld [vmem:[#allocation2 + $0xc] sm:$0xff] }
 0x10e   : > { %1460 = vmatpush.bf16.msrb.mxu2 %v3020_v49  ;;  %v592_v49 = vpop.permute.xlu2 %591 }
 0x110   : > { %v479_v50 = vpop.f32.mrf.mxu0  ;;  %v3572_v52 = vld [vmem:[#allocation2 + $0x28] sm:$0xff] }
 0x111   : > { %v480_v56 = vadd.f32 %v3407_v54, %v479_v50  ;;  %971 = vmatmul.bf16.gmra.mxu2 %v3572_v52  ;;  %v1011_v57 = vrot.slane %v3572_v52, 1  ;;  %v769_v59 = vshll.u32 %v3572_v52, 16  ;;  %v3579_v60 = vld [vmem:[#allocation2 + $0x28] sm:$0xff]  ;;  %v773_v50 = vshrl.u32 %v3572_v52, 16 }
 0x112   : > { %v2065_v9 = vrot.slane %v3579_v60, 3  ;;  %v1900_v11 = vshrl.u32 %v3579_v60, 16  ;;  %v1903_v45 = vshll.u32 %v3579_v60, 16 }
 0x113   : > { %v500_v62 = vmax.f32 %v480_v56, 0.0  ;;  %v1012_v63 = vsel %vm1001_vm0, %v1009_v12, %v1011_v57  ;;  %v3584_v2 = vrot.slane %v769_v59, 1  ;;  %v3028_v56 = vld [vmem:[%s4065_s4 + $0x140] sm:$0xff] }
 0x114   : > { %1098 = vmatmul.bf16.gmra.mxu3 %v1012_v63  ;;  %v3605_v13 = vsel %vm2057_vm2, %v2063_v27, %v2065_v9  ;;  %v1902_v14 = vrot.slane %v1900_v11, 2  ;;  %v1905_v15 = vrot.slane %v1903_v45, 3  ;;  %v3013_v27 = vld [vmem:[%s4065_s4 + $0xc8] sm:$0xff] }
 0x115   : > { %v612_v5 = vmul.f32 %v3471_v24, %v500_v62  ;;  %v772_v8 = vsel %vm728_vm1, %v767_v1, %v3584_v2  ;;  %v3031_v24 = vld [vmem:[%s4065_s4 + $0x158] sm:$0xff]  ;;  %1265 = vmatpush.bf16.msrb.mxu1 %v3013_v27 }
 0x116   : > { %867 = vmatmul.bf16.gmra.mxu0 %v772_v8  ;;  %1602 = vmatpush.bf16.msrb.mxu3 %v3031_v24  ;;  %v3613_v19 = vor.u32 %v1905_v15, %v1902_v14  ;;  %v1340_v15 = vshll.u32 %v3660_v7, 16 }
 0x117   : > { %v3106_v10 = vpack.c.bf16 %v612_v5, %v611_v4  ;;  %v775_v5 = vor.u32 %v773_v50, %v3584_v2  ;;  %v1345_v2 = vshrl.u32 %v3642_v55, 16  ;;  %v1354_v50 = vshrl.u32 %v3688_v37, 16 }
 0x118   : > { %v482_v12 = vpop.f32.mrf.mxu0  ;;  %v3621_v23 = vsel %vm1863_vm3, %v1897_v42, %v3613_v19  ;;  %v1342_v26 = vrot.slane %v1340_v15, 2 }
 0x119   : > { %3146 = vst [vmem:[#allocation2 + $0x30] sm:$0xff] %v3106_v10   ;;  %v483_v22 = vadd.f32 %v3407_v54, %v482_v12  ;;  %v1348_v12 = vshll.u32 %v3642_v55, 16  ;;  %1266 = vmatpush.bf16.msrb.mxu1 %v3012_v3 }
 0x11a   : > { %1603 = vmatpush.bf16.msrb.mxu3 %v3030_v18  ;;  %v1347_v18 = vrot.slane %v1345_v2, 1 }
 0x11b   : > { %v501_v33 = vmax.f32 %v483_v22, 0.0  ;;  %v1350_v21 = vrot.slane %v1348_v12, 2  ;;  %v3725_v12 = vld [vmem:[#allocation2 + $0x1c] sm:$0xff] }
 0x11c   : > { %v1366_v15 = vshll.u32 %v3725_v12, 16 }
 0x11d   : > { %v613_v62 = vmul.f32 %v592_v49, %v501_v33  ;;  %v1351_v27 = vor.u32 %v1350_v21, %v1347_v18 }
 0x11e   : > { %1604 = vmatpush.bf16.msrb.mxu3 %v3029_v25  ;;  %v1368_v18 = vrot.slane %v1366_v15, 2 }
 0x120   : > { %v484_v28 = vpop.f32.mrf.mxu0  ;;  %v3629_v30 = vld [vmem:[#allocation2 + $0x30] sm:$0xff]  }
 0x121   : > { %v676_v31 = vld [vmem:[#allocation2 + $0x34] sm:$0x1]  ;;  %v485_v41 = vadd.f32 %v3407_v54, %v484_v28  ;;  %v719_v34 = vunpack.c.l.b16 %v3629_v30  ;;  %v1719_v54 = vrot.slane %v3443_v51, 2 }
 0x122   : > { %v3631_v32 = vld [vmem:[#allocation2 + $0x30] sm:$0xff]  ;;  %v720_v35 = vunpack.c.l.b16 %v676_v31  ;;  %1605 = vmatpush.bf16.msrb.mxu3 %v3028_v56  ;;  %v1722_v31 = vrot.slane %v3488_v39, 2  ;;  %v1357_v56 = vshll.u32 %v3688_v37, 16 }
 0x123   : > { %v502_v40 = vmax.f32 %v485_v41, 0.0  ;;  %v882_v44 = vpack.c.b16 %v719_v34, %v719_v34  ;;  %v2067_v46 = vrot.slane %v3631_v32, 3  ;;  %v1909_v58 = vshrl.u32 %v3631_v32, 16 }
 0x124   : > { %v3637_v42 = vpack.c.b16 %v720_v35, %v719_v34  ;;  %v1912_v59 = vshll.u32 %v3631_v32, 16  ;;  %v1721_v4 = vsel %vm1529_vm4, %v1719_v54, %v1720_v36 }
 0x125   : > { %v614_v63 = vmul.f32 %v597_v48, %v502_v40  ;;  %976 = vmatmul.bf16.gmra.mxu2 %v882_v44  ;;  %v3670_v45 = vsel %vm2057_vm2, %v2065_v9, %v2067_v46  ;;  %v1911_v24 = vrot.slane %v1909_v58, 2  ;;  %v3056_v9 = vld [vmem:[%s4065_s4 + $0x1f8] sm:$0xff]  ;;  %v1723_v44 = vsel %vm1529_vm4, %v1720_v36, %v1722_v31 }
 0x126   : > { %v1013_v1 = vrot.slane %v3637_v42, 1  ;;  %v777_v51 = vshll.u32 %v3637_v42, 16  ;;  %1795 = vmatmul.bf16.vlgmr.msra.gmra.mxu0 %v1721_v4  ;;  %v1914_v14 = vrot.slane %v1912_v59, 3  ;;  %v781_v39 = vshrl.u32 %v3637_v42, 16 }
 0x127   : > { %v3111_v8 = vpack.c.bf16 %v614_v63, %v613_v62  ;;  %v1356_v63 = vrot.slane %v1354_v50, 1 }
 0x128   : > { %v1014_v10 = vsel %vm1001_vm0, %v1011_v57, %v1013_v1  ;;  %v779_v11 = vrot.slane %v777_v51, 1  ;;  %v1337_v57 = vshrl.u32 %v3660_v7, 16  ;;  %v1915_v17 = vor.u32 %v1914_v14, %v1911_v24  ;;  %v1509_v51 = vld [vmem:[#allocation2 + $0x4] sm:$0xc] }
 0x129   : > { %1103 = vmatmul.bf16.gmra.mxu3 %v1014_v10  ;;  %3147 = vst [vmem:[#allocation2 + $0x38] sm:$0xff] %v3111_v8   ;;  %v1527_v4 = vunpack.c.l.b16 %v1509_v51  ;;  %v1192_v14 = vrot.slane %v3642_v55, 1 }
 0x12a   : > { %v780_v52 = vsel %vm728_vm1, %v775_v5, %v779_v11  ;;  %v3682_v22 = vsel %vm1863_vm3, %v3613_v19, %v1915_v17  ;;  %v1339_v25 = vrot.slane %v1337_v57, 1  ;;  %v783_v58 = vor.u32 %v781_v39, %v779_v11 }
 0x12b   : > { %872 = vmatmul.bf16.vlgmr.msra.gmra.mxu1 %v780_v52  ;;  %v1528_v8 = vpack.c.b16 %v1171_v38, %v1527_v4  ;;  %v1531_v11 = vrot.slane %v3642_v55, 2  ;;  %v3731_v52 = vld [vmem:[%s4065_s4 + $0x238] sm:$0xff]  ;;  %v1191_v57 = vrot.slane %v3660_v7, 1  ;;  %v1363_v55 = vshrl.u32 %v3725_v12, 16  ;;  %v3053_v7 = vld [vmem:[%s4065_s4 + $0x1e0] sm:$0xff] }
 0x12c   : > { %1981 = vmatpush.bf16.msra.mxu1 %v3056_v9  ;;  %v1343_v34 = vor.u32 %v1342_v26, %v1339_v25  ;;  %3165 = vmatpush.bf16.msra.mxu2 %v3731_v52  ;;  %v3746_v26 = vld [vmem:[%s4065_s4 + $0x230] sm:$0xff]  ;;  %v1194_v39 = vrot.slane %v3688_v37, 1 }
 0x12d   : > { %v1530_v24 = vrot.slane %v1528_v8, 2  ;;  %v1193_v9 = vsel %vm1001_vm0, %v1191_v57, %v1192_v14  ;;  %v3770_v8 = vld [vmem:[%s4065_s4 + $0x228] sm:$0xff] }
 0x12e   : > { %v1352_v40 = vsel %vm1335_vm5, %v1343_v34, %v1351_v27 }
 0x12f   : > { %v1532_v38 = vsel %vm1529_vm4, %v1530_v24, %v1531_v11 }
 0x130   : > { %v3684_v28 = vld [vmem:[#allocation2 + $0x38] sm:$0xf]  ;;  %v1843_v41 = vld [vmem:[#allocation2 + $0x3c] sm:$0x7]  ;;  %1982 = vmatpush.bf16.msra.mxu1 %v3055_v0  ;;  %3166 = vmatpush.bf16.msra.mxu2 %v3746_v26  ;;  %v1195_v0 = vsel %vm1001_vm0, %v1192_v14, %v1194_v39  ;;  %v3779_v14 = vld [vmem:[#allocation2 + $0x2c] sm:$0xff] }
 0x131   : > { %v1710_v33 = vunpack.c.l.b16 %v3684_v28  ;;  %v1861_v35 = vunpack.c.l.b16 %v1843_v41 }
 0x133   : > { %v3693_v19 = vpack.c.b16 %v1861_v35, %v1710_v33  ;;  %v3755_v35 = vld [vmem:[#allocation2 + $0x24] sm:$0xff] }
 0x134   : > { %1983 = vmatpush.bf16.msra.mxu1 %v3054_v43  ;;  %v1372_v50 = vshrl.u32 %v3755_v35, 16  ;;  %3167 = vmatpush.bf16.msra.mxu2 %v3770_v8 }
 0x135   : > { %1461 = vmatmul.bf16.vlgmr.msrb.gmra.mxu2 %v1352_v40  ;;  %v2069_v48 = vrot.slane %v3693_v19, 3  ;;  %v1918_v49 = vshrl.u32 %v3693_v19, 16  ;;  %v1921_v54 = vshll.u32 %v3693_v19, 16 }
 0x136   : > { %1800 = vmatmul.bf16.gmra.mxu0 %v1723_v44 }
 0x137   : > { %v3712_v36 = vsel %vm2057_vm2, %v2067_v46, %v2069_v48  ;;  %v1920_v42 = vrot.slane %v1918_v49, 2  ;;  %v1923_v59 = vrot.slane %v1921_v54, 3  ;;  %v1724_v46 = vrot.slane %v3526_v16, 2 }
 0x138   : > { %1984 = vmatpush.bf16.msra.mxu1 %v3053_v7 }
 0x139   : > { %1108 = vmatmul.bf16.gmra.mxu3 %v1013_v1  ;;  %v3714_v62 = vor.u32 %v1923_v59, %v1920_v42  ;;  %v1359_v1 = vrot.slane %v1357_v56, 2  ;;  %v1725_v16 = vsel %vm1529_vm4, %v1722_v31, %v1724_v46  ;;  %v1533_v31 = vrot.slane %v3688_v37, 2 }
 0x13a   : > { %v1375_v56 = vshll.u32 %v3755_v35, 16  ;;  %v1374_v59 = vrot.slane %v1372_v50, 1 }
 0x13b   : > { %877 = vmatmul.bf16.gmra.mxu1 %v783_v58  ;;  %v3718_v3 = vsel %vm1863_vm3, %v1915_v17, %v3714_v62  ;;  %v1360_v5 = vor.u32 %v1359_v1, %v1356_v63  ;;  %v1365_v17 = vrot.slane %v1363_v55, 1  ;;  %v1534_v54 = vsel %vm1529_vm4, %v1531_v11, %v1533_v31 }
 0x13c   : > { %v947_v10 = vpop.f32.mrf.mxu2  ;;  %v1377_v63 = vrot.slane %v1375_v56, 2  ;;  %v1535_v11 = vrot.slane %v3725_v12, 2 }
 0x13d   : > { %v1361_v2 = vsel %vm1335_vm5, %v1351_v27, %v1360_v5  ;;  %v1369_v25 = vor.u32 %v1368_v18, %v1365_v17  ;;  %v1726_v27 = vrot.slane %v3579_v60, 2  ;;  %v1384_v17 = vshll.u32 %v3779_v14, 16 }
 0x13e   : > { %v1378_v4 = vor.u32 %v1377_v63, %v1374_v59  ;;  %v1536_v55 = vsel %vm1529_vm4, %v1533_v31, %v1535_v11  ;;  %v1315_v31 = vld [vmem:[#allocation2 + $0x38] sm:$0x3] }
 0x13f   : > { %v1370_v34 = vsel %vm1335_vm5, %v1360_v5, %v1369_v25  ;;  %v1727_v49 = vsel %vm1529_vm4, %v1724_v46, %v1726_v27  ;;  %v3052_v46 = vld [vmem:[%s4065_s4 + $0x1d8] sm:$0xff] }
 0x140   : > { %1985 = vmatpush.bf16.msra.mxu1 %v3052_v46  ;;  %v1379_v24 = vsel %vm1335_vm5, %v1369_v25, %v1378_v4 }
 0x144   : > { %v949_v21 = vpop.f32.mrf.mxu2 }
 0x145   : > { %1466 = vmatmul.bf16.gmra.mxu2 %v1361_v2 }
 0x146   : > { %1805 = vmatmul.bf16.gmra.mxu0 %v1725_v16 }
 0x149   : > { %1606 = vmatmul.bf16.vlgmr.msrb.gmra.mxu3 %v1532_v38  ;;  %v1196_v38 = vrot.slane %v3725_v12, 1 }
 0x14b   : > { %1267 = vmatmul.bf16.vlgmr.msrb.gmra.mxu1 %v1193_v9  ;;  %v1381_v9 = vshrl.u32 %v3779_v14, 16 }
 0x14d   : > { %v1383_v12 = vrot.slane %v1381_v9, 1 }
 0x153   : > { %v848_v41 = vpop.f32.mrf.mxu0 }
 0x154   : > { %v948_v40 = vadd.f32 %v947_v10, %v848_v41  ;;  %v952_v44 = vpop.f32.mrf.mxu2  ;;  %v1728_v10 = vrot.slane %v3631_v32, 2  ;;  %v1667_v32 = vld [vmem:[#allocation2 + $0x3c] sm:$0x3]  ;;  %v1386_v41 = vrot.slane %v1384_v17, 2 }
 0x155   : > { %1471 = vmatmul.bf16.gmra.mxu2 %v1370_v34  ;;  %v1711_v25 = vunpack.c.l.b16 %v1667_v32 }
 0x156   : > { %1810 = vmatmul.bf16.gmra.mxu0 %v1727_v49  ;;  %v1729_v57 = vsel %vm1529_vm4, %v1726_v27, %v1728_v10 }
 0x157   : > { %v1079_v60 = vpop.f32.mrf.mxu3 }
 0x158   : > { %v3762_v58 = vadd.f32 %v1079_v60, %v948_v40  ;;  %v3792_v40 = vld [vmem:[%s4065_s4 + $0x220] sm:$0xff]  ;;  %v1333_v60 = vunpack.c.l.b16 %v1315_v31 }
 0x159   : > { %1611 = vmatmul.bf16.gmra.mxu3 %v1534_v54  ;;  %3168 = vmatpush.bf16.msra.mxu2 %v3792_v40  ;;  %v1387_v54 = vor.u32 %v1386_v41, %v1383_v12 }
 0x15b   : > { %1272 = vmatmul.bf16.gmra.mxu1 %v1195_v0  ;;  %v850_v42 = vpop.f32.mrf.mxu0  ;;  %v1182_v0 = vunpack.c.h.b16 %v3629_v30  ;;  %v1388_v63 = vsel %vm1335_vm5, %v1378_v4, %v1387_v54 }
 0x15c   : > { %v950_v37 = vadd.f32 %v949_v21, %v850_v42  ;;  %v954_v1 = vpop.f32.mrf.mxu2  ;;  %v1197_v21 = vsel %vm1001_vm0, %v1194_v39, %v1196_v38  ;;  %v1718_v39 = vpack.c.b16 %v1711_v25, %v1710_v33  ;;  %v1537_v42 = vrot.slane %v3755_v35, 2 }
 0x15d   : > { %v1539_v25 = vrot.slane %v3779_v14, 2 }
 0x15e   : > { %v1730_v56 = vrot.slane %v1718_v39, 2  ;;  %v1538_v30 = vsel %vm1529_vm4, %v1535_v11, %v1537_v42 }
 0x15f   : > { %v1081_v51 = vpop.f32.mrf.mxu3  ;;  %v1540_v31 = vsel %vm1529_vm4, %v1537_v42, %v1539_v25 }
 0x160   : > { %v3765_v5 = vadd.f32 %v1081_v51, %v950_v37  ;;  %v3805_v37 = vpack.c.b16 %v1333_v60, %v1182_v0  ;;  %v3811_v51 = vld [vmem:[%s4065_s4 + $0x218] sm:$0xff]  ;;  %v1731_v46 = vsel %vm1529_vm4, %v1728_v10, %v1730_v56  ;;  %v3059_v10 = vld [vmem:[%s4065_s4 + $0x210] sm:$0xff] }
 0x161   : > { %3169 = vmatpush.bf16.msra.mxu2 %v3811_v51  ;;  %v1139_v60 = vld [vmem:[#allocation2 + $0x38] sm:$0x1] }
 0x163   : > { %v853_v2 = vpop.f32.mrf.mxu0 }
 0x164   : > { %v953_v43 = vadd.f32 %v952_v44, %v853_v2  ;;  %v957_v16 = vpop.f32.mrf.mxu2  ;;  %v3051_v44 = vld [vmem:[%s4065_s4 + $0x1d0] sm:$0xff]  ;;  %v1390_v2 = vshrl.u32 %v3805_v37, 16 }
 0x165   : > { %1476 = vmatmul.bf16.gmra.mxu2 %v1379_v24  ;;  %1986 = vmatpush.bf16.msra.mxu1 %v3051_v44  ;;  %v1393_v24 = vshll.u32 %v3805_v37, 16 }
 0x166   : > { %1815 = vmatmul.bf16.gmra.mxu0 %v1729_v57  ;;  %v1392_v11 = vrot.slane %v1390_v2, 1  ;;  %3170 = vmatpush.bf16.msra.mxu2 %v3059_v10 }
 0x167   : > { %v1084_v15 = vpop.f32.mrf.mxu3  ;;  %v1395_v57 = vrot.slane %v1393_v24, 2 }
 0x168   : > { %v3786_v18 = vadd.f32 %v1084_v15, %v953_v43  ;;  %v3050_v15 = vld [vmem:[%s4065_s4 + $0x1c8] sm:$0xff] }
 0x169   : > { %1616 = vmatmul.bf16.gmra.mxu3 %v1536_v55  ;;  %1987 = vmatpush.bf16.msra.mxu1 %v3050_v15  ;;  %v1396_v17 = vor.u32 %v1395_v57, %v1392_v11 }
 0x16b   : > { %1277 = vmatmul.bf16.gmra.mxu1 %v1197_v21  ;;  %v855_v7 = vpop.f32.mrf.mxu0  ;;  %v3057_v21 = vld [vmem:[%s4065_s4 + $0x200] sm:$0xff]  ;;  %v1397_v12 = vsel %vm1335_vm5, %v1387_v54, %v1396_v17 }
 0x16c   : > { %v955_v27 = vadd.f32 %v954_v1, %v855_v7  ;;  %v959_v34 = vpop.f32.mrf.mxu2  ;;  %v1198_v1 = vrot.slane %v3755_v35, 1  ;;  %v3049_v54 = vld [vmem:[%s4065_s4 + $0x1c0] sm:$0xff] }
 0x16d   : > { %1988 = vmatpush.bf16.msra.mxu1 %v3049_v54 }
 0x16e   : > { %v1199_v35 = vsel %vm1001_vm0, %v1196_v38, %v1198_v1  ;;  %v3058_v38 = vld [vmem:[%s4065_s4 + $0x208] sm:$0xff] }
 0x16f   : > { %v1086_v49 = vpop.f32.mrf.mxu3  ;;  %3171 = vmatpush.bf16.msra.mxu2 %v3058_v38 }
 0x170   : > { %v3800_v50 = vadd.f32 %v1086_v49, %v955_v27 }
 0x171   : > { %2126 = vmatpush.bf16.msrb.mxu1 %v3731_v52 }
 0x173   : > { %v858_v59 = vpop.f32.mrf.mxu0  ;;  %3172 = vmatpush.bf16.msra.mxu2 %v3057_v21 }
 0x174   : > { %v958_v28 = vadd.f32 %v957_v16, %v858_v59  ;;  %v962_v33 = vpop.f32.mrf.mxu2 }
 0x175   : > { %1481 = vmatmul.bf16.gmra.mxu2 %v1388_v63  ;;  %2127 = vmatpush.bf16.msrb.mxu1 %v3746_v26 }
 0x176   : > { %1820 = vmatmul.bf16.gmra.mxu0 %v1731_v46 }
 0x177   : > { %v1089_v4 = vpop.f32.mrf.mxu3 }
 0x178   : > { %v3818_v43 = vadd.f32 %v1089_v4, %v958_v28 }
 0x179   : > { %1621 = vmatmul.bf16.gmra.mxu3 %v1538_v30  ;;  %2128 = vmatpush.bf16.msrb.mxu1 %v3770_v8 }
 0x17b   : > { %1282 = vmatmul.bf16.gmra.mxu1 %v1199_v35  ;;  %v860_v16 = vpop.f32.mrf.mxu0 }
 0x17c   : > { %v3824_v55 = vadd.f32 %v959_v34, %v860_v16  ;;  %v964_v32 = vpop.f32.mrf.mxu2  ;;  %v1200_v34 = vrot.slane %v3779_v14, 1  ;;  %v1183_v14 = vunpack.c.l.b16 %v1139_v60 }
 0x17d   : > { %2129 = vmatpush.bf16.msrb.mxu1 %v3792_v40 }
 0x17e   : > { %v1201_v49 = vsel %vm1001_vm0, %v1198_v1, %v1200_v34  ;;  %v1190_v42 = vpack.c.b16 %v1183_v14, %v1182_v0 }
 0x17f   : > { %v3832_v9 = vpop.f32.mrf.mxu3 }
 0x180   : > { %v1202_v30 = vrot.slane %v1190_v42, 1 }
 0x181   : > { %2130 = vmatpush.bf16.msrb.mxu1 %v3811_v51 }
 0x182   : > { %v1203_v52 = vsel %vm1001_vm0, %v1200_v34, %v1202_v30 }
 0x183   : > { %v863_v7 = vpop.f32.mrf.mxu0 }
 0x184   : > { %v963_v41 = vadd.f32 %v962_v33, %v863_v7  ;;  %v967_v27 = vpop.f32.mrf.mxu2  ;;  %v1541_v33 = vrot.slane %v3805_v37, 2 }
 0x185   : > { %1486 = vmatmul.bf16.gmra.mxu2 %v1397_v12  ;;  %2131 = vmatpush.bf16.msrb.mxu1 %v3059_v10 }
 0x186   : > { %1825 = vmatmul.bf16.gmra.mxu0 %v1730_v56  ;;  %v1542_v2 = vsel %vm1529_vm4, %v1539_v25, %v1541_v33 }
 0x187   : > { %v1094_v44 = vpop.f32.mrf.mxu3 }
 0x188   : > { %v3841_v39 = vadd.f32 %v1094_v44, %v963_v41 }
 0x189   : > { %1626 = vmatmul.bf16.gmra.mxu3 %v1540_v31  ;;  %2132 = vmatpush.bf16.msrb.mxu1 %v3058_v38 }
 0x18b   : > { %1287 = vmatmul.bf16.gmra.mxu1 %v1201_v49  ;;  %v865_v59 = vpop.f32.mrf.mxu0 }
 0x18c   : > { %v3847_v63 = vadd.f32 %v964_v32, %v865_v59  ;;  %v969_v28 = vpop.f32.mrf.mxu2 }
 0x18d   : > { %2133 = vmatpush.bf16.msrb.mxu1 %v3057_v21 }
 0x18f   : > { %v3850_v56 = vpop.f32.mrf.mxu3 }
 0x193   : > { %v868_v1 = vpop.f32.mrf.mxu0 }
 0x194   : > { %v968_v46 = vadd.f32 %v967_v27, %v868_v1  ;;  %v972_v4 = vpop.f32.mrf.mxu2 }
 0x195   : > { %1491 = vmatmul.bf16.gmra.mxu2 %v1396_v17 }
 0x197   : > { %v1099_v24 = vpop.f32.mrf.mxu3 }
 0x198   : > { %v3856_v35 = vadd.f32 %v1099_v24, %v968_v46 }
 0x199   : > { %1631 = vmatmul.bf16.gmra.mxu3 %v1542_v2 }
 0x19b   : > { %1292 = vmatmul.bf16.gmra.mxu1 %v1203_v52  ;;  %v870_v0 = vpop.f32.mrf.mxu0 }
 0x19c   : > { %v3860_v26 = vadd.f32 %v969_v28, %v870_v0  ;;  %v974_v37 = vpop.f32.mrf.mxu2 }
 0x19f   : > { %v3863_v16 = vpop.f32.mrf.mxu3 }
 0x1a3   : > { %v1796_v11 = vpop.f32.mrf.mxu0 }
 0x1a5   : > { %2139 = vmatmul.bf16.vlgmr.msra.gmra.mxu2 %v3499_v61 }
 0x1a8   : > { %v873_v8 = vpop.f32.mrf.mxu1  ;;  %v977_v32 = vpop.f32.mrf.mxu2 }
 0x1a9   : > { %v973_v57 = vadd.f32 %v972_v4, %v873_v8  ;;  %1636 = vmatmul.bf16.gmra.mxu3 %v1541_v33 }
 0x1ab   : > { %1297 = vmatmul.bf16.gmra.mxu1 %v1202_v30  ;;  %v1798_v17 = vpop.f32.mrf.mxu0 }
 0x1ac   : > { %v1104_v15 = vpop.f32.mrf.mxu3 }
 0x1ad   : > { %v3866_v40 = vadd.f32 %v1104_v15, %v973_v57 }
 0x1b0   : > { %v875_v25 = vpop.f32.mrf.mxu1  ;;  %v979_v7 = vpop.f32.mrf.mxu2 }
 0x1b1   : > { %v3868_v51 = vadd.f32 %v974_v37, %v875_v25  ;;  %v3072_v37 = vld [vmem:[%s4067_s6 + $0x38] sm:$0xff] }
 0x1b2   : > { %3173 = vmatpush.bf16.msra.mxu3 %v3072_v37 }
 0x1b3   : > { %v1801_v10 = vpop.f32.mrf.mxu0 }
 0x1b4   : > { %v3870_v12 = vpop.f32.mrf.mxu3 }
 0x1b5   : > { %2144 = vmatmul.bf16.gmra.mxu2 %v3545_v53 }
 0x1b8   : > { %v878_v61 = vpop.f32.mrf.mxu1  ;;  %v1462_v41 = vpop.f32.mrf.mxu2 }
 0x1b9   : > { %v978_v38 = vadd.f32 %v977_v32, %v878_v61 }
 0x1bb   : > { %1989 = vmatmul.bf16.vlgmr.msra.gmra.mxu1 %v3478_v29  ;;  %v1803_v21 = vpop.f32.mrf.mxu0 }
 0x1bc   : > { %v1109_v27 = vpop.f32.mrf.mxu3  ;;  %2315 = vmatpush.bf16.msra.mxu1 %v3072_v37 }
 0x1bd   : > { %v3874_v34 = vadd.f32 %v1109_v27, %v978_v38 }
 0x1c0   : > { %v880_v31 = vpop.f32.mrf.mxu1  ;;  %v1464_v44 = vpop.f32.mrf.mxu2 }
 0x1c3   : > { %v1806_v60 = vpop.f32.mrf.mxu0 }
 0x1c4   : > { %v1111_v49 = vpop.f32.mrf.mxu3 }
 0x1c5   : > { %2149 = vmatmul.bf16.gmra.mxu2 %v3605_v13 }
 0x1c8   : > { %v1268_v59 = vpop.f32.mrf.mxu1  ;;  %v1467_v28 = vpop.f32.mrf.mxu2 }
 0x1c9   : > { %v1302_v54 = vadd.f32 %v1268_v59, %v3762_v58 }
 0x1cb   : > { %1994 = vmatmul.bf16.gmra.mxu1 %v3512_v6  ;;  %v1496_v53 = vadd.f32 %v1462_v41, %v1302_v54  ;;  %v1808_v29 = vpop.f32.mrf.mxu0 }
 0x1cc   : > { %v1607_v14 = vpop.f32.mrf.mxu3 }
 0x1cd   : > { %v1641_v42 = vadd.f32 %v1607_v14, %v1496_v53 }
 0x1cf   : > { %v3879_v33 = vadd.f32 %v1796_v11, %v1641_v42 }
 0x1d0   : > { %v1270_v1 = vpop.f32.mrf.mxu1  ;;  %v1469_v30 = vpop.f32.mrf.mxu2 }
 0x1d1   : > { %v1303_v46 = vadd.f32 %v1270_v1, %v3765_v5 }
 0x1d3   : > { %v1497_v4 = vadd.f32 %v1464_v44, %v1303_v46  ;;  %v1811_v13 = vpop.f32.mrf.mxu0 }
 0x1d4   : > { %v1609_v2 = vpop.f32.mrf.mxu3 }
 0x1d5   : > { %v1642_v24 = vadd.f32 %v1609_v2, %v1497_v4  ;;  %2154 = vmatmul.bf16.gmra.mxu2 %v3670_v45 }
 0x1d7   : > { %v3883_v58 = vadd.f32 %v1798_v17, %v1642_v24  ;;  %v1120_v24 = vadd.f32 %v3850_v56, %v3847_v63 }
 0x1d8   : > { %v1273_v52 = vpop.f32.mrf.mxu1  ;;  %v1472_v0 = vpop.f32.mrf.mxu2 }
 0x1d9   : > { %v1304_v6 = vadd.f32 %v1273_v52, %v3786_v18 }
 0x1db   : > { %1999 = vmatmul.bf16.gmra.mxu1 %v3564_v47  ;;  %v1498_v5 = vadd.f32 %v1467_v28, %v1304_v6  ;;  %v1813_v57 = vpop.f32.mrf.mxu0 }
 0x1dc   : > { %v1612_v11 = vpop.f32.mrf.mxu3 }
 0x1dd   : > { %v1643_v8 = vadd.f32 %v1612_v11, %v1498_v5 }
 0x1df   : > { %v3890_v32 = vadd.f32 %v1801_v10, %v1643_v8  ;;  %v3071_v10 = vld [vmem:[%s4067_s6 + $0x30] sm:$0xff] }
 0x1e0   : > { %v1275_v45 = vpop.f32.mrf.mxu1  ;;  %v1474_v17 = vpop.f32.mrf.mxu2  ;;  %3174 = vmatpush.bf16.msra.mxu3 %v3071_v10  ;;  %2316 = vmatpush.bf16.msra.mxu1 %v3071_v10 }
 0x1e1   : > { %v1305_v15 = vadd.f32 %v1275_v45, %v3800_v50 }
 0x1e3   : > { %v1499_v18 = vadd.f32 %v1469_v30, %v1305_v15  ;;  %v1816_v61 = vpop.f32.mrf.mxu0 }
 0x1e4   : > { %v1614_v25 = vpop.f32.mrf.mxu3 }
 0x1e5   : > { %v1644_v7 = vadd.f32 %v1614_v25, %v1499_v18  ;;  %2159 = vmatmul.bf16.gmra.mxu2 %v3712_v36  ;;  %v1118_v36 = vadd.f32 %v3832_v9, %v3824_v55 }
 0x1e7   : > { %v3894_v38 = vadd.f32 %v1803_v21, %v1644_v7 }
 0x1e8   : > { %v1278_v47 = vpop.f32.mrf.mxu1  ;;  %v1477_v27 = vpop.f32.mrf.mxu2 }
 0x1e9   : > { %v1306_v41 = vadd.f32 %v1278_v47, %v3818_v43  ;;  %v3068_v47 = vld [vmem:[%s4067_s6 + $0x18] sm:$0xff] }
 0x1eb   : > { %2004 = vmatmul.bf16.gmra.mxu1 %v3621_v23  ;;  %v1500_v50 = vadd.f32 %v1472_v0, %v1306_v41  ;;  %v1818_v49 = vpop.f32.mrf.mxu0  ;;  %v3070_v23 = vld [vmem:[%s4067_s6 + $0x28] sm:$0xff] }
 0x1ec   : > { %v1617_v31 = vpop.f32.mrf.mxu3  ;;  %3175 = vmatpush.bf16.msra.mxu3 %v3070_v23  ;;  %2317 = vmatpush.bf16.msra.mxu1 %v3070_v23 }
 0x1ed   : > { %v1645_v44 = vadd.f32 %v1617_v31, %v1500_v50 }
 0x1ef   : > { %v3903_v21 = vadd.f32 %v1806_v60, %v1645_v44  ;;  %v1124_v44 = vadd.f32 %v3870_v12, %v3868_v51 }
 0x1f0   : > { %v1280_v59 = vpop.f32.mrf.mxu1  ;;  %v1479_v54 = vpop.f32.mrf.mxu2 }
 0x1f1   : > { %v1307_v43 = vadd.f32 %v1280_v59, %v1118_v36 }
 0x1f3   : > { %v1501_v28 = vadd.f32 %v1474_v17, %v1307_v43  ;;  %v1821_v42 = vpop.f32.mrf.mxu0  ;;  %v1122_v17 = vadd.f32 %v3863_v16, %v3860_v26 }
 0x1f4   : > { %v1619_v53 = vpop.f32.mrf.mxu3 }
 0x1f5   : > { %v1646_v14 = vadd.f32 %v1619_v53, %v1501_v28  ;;  %2164 = vmatmul.bf16.gmra.mxu2 %v2069_v48 }
 0x1f7   : > { %v3910_v1 = vadd.f32 %v1808_v29, %v1646_v14 }
 0x1f8   : > { %v1283_v55 = vpop.f32.mrf.mxu1  ;;  %v1482_v60 = vpop.f32.mrf.mxu2 }
 0x1f9   : > { %v1308_v9 = vadd.f32 %v1283_v55, %v3841_v39 }
 0x1fb   : > { %2009 = vmatmul.bf16.gmra.mxu1 %v3682_v22  ;;  %v1502_v46 = vadd.f32 %v1477_v27, %v1308_v9  ;;  %v1823_v2 = vpop.f32.mrf.mxu0  ;;  %v3069_v22 = vld [vmem:[%s4067_s6 + $0x20] sm:$0xff]  ;;  %v3066_v9 = vld [vmem:[%s4067_s6 + $0x8] sm:$0xff] }
 0x1fc   : > { %v1622_v30 = vpop.f32.mrf.mxu3  ;;  %3176 = vmatpush.bf16.msra.mxu3 %v3069_v22  ;;  %2318 = vmatpush.bf16.msra.mxu1 %v3069_v22 }
 0x1fd   : > { %v1647_v4 = vadd.f32 %v1622_v30, %v1502_v46 }
 0x1ff   : > { %v3916_v52 = vadd.f32 %v1811_v13, %v1647_v4 }
 0x200   : > { %v1285_v19 = vpop.f32.mrf.mxu1  ;;  %v1484_v29 = vpop.f32.mrf.mxu2  ;;  %3177 = vmatpush.bf16.msra.mxu3 %v3068_v47  ;;  %2319 = vmatpush.bf16.msra.mxu1 %v3068_v47 }
 0x201   : > { %v1309_v48 = vadd.f32 %v1285_v19, %v1120_v24 }
 0x203   : > { %v1503_v6 = vadd.f32 %v1479_v54, %v1309_v48  ;;  %v1826_v5 = vpop.f32.mrf.mxu0 }
 0x204   : > { %v1624_v0 = vpop.f32.mrf.mxu3 }
 0x205   : > { %v1648_v37 = vadd.f32 %v1624_v0, %v1503_v6 }
 0x207   : > { %v3921_v39 = vadd.f32 %v1813_v57, %v1648_v37 }
 0x208   : > { %v1288_v11 = vpop.f32.mrf.mxu1  ;;  %v1487_v56 = vpop.f32.mrf.mxu2 }
 0x209   : > { %v1310_v63 = vadd.f32 %v1288_v11, %v3856_v35 }
 0x20b   : > { %2014 = vmatmul.bf16.gmra.mxu1 %v3718_v3  ;;  %v1504_v13 = vadd.f32 %v1482_v60, %v1310_v63  ;;  %v1828_v15 = vpop.f32.mrf.mxu0 }
 0x20c   : > { %v1627_v8 = vpop.f32.mrf.mxu3 }
 0x20d   : > { %v1649_v45 = vadd.f32 %v1627_v8, %v1504_v13 }
 0x20f   : > { %v3927_v18 = vadd.f32 %v1816_v61, %v1649_v45 }
 0x210   : > { %v1290_v25 = vpop.f32.mrf.mxu1  ;;  %v1489_v57 = vpop.f32.mrf.mxu2 }
 0x211   : > { %v1311_v7 = vadd.f32 %v1290_v25, %v1122_v17 }
 0x213   : > { %v1505_v35 = vadd.f32 %v1484_v29, %v1311_v7 }
 0x214   : > { %v1629_v3 = vpop.f32.mrf.mxu3 }
 0x215   : > { %v1650_v41 = vadd.f32 %v1629_v3, %v1505_v35 }
 0x217   : > { %v3932_v27 = vadd.f32 %v1818_v49, %v1650_v41  ;;  %v3067_v49 = vld [vmem:[%s4067_s6 + $0x10] sm:$0xff] }
 0x218   : > { %v1293_v10 = vpop.f32.mrf.mxu1  ;;  %v1492_v26 = vpop.f32.mrf.mxu2  ;;  %3178 = vmatpush.bf16.msra.mxu3 %v3067_v49  ;;  %2320 = vmatpush.bf16.msra.mxu1 %v3067_v49 }
 0x219   : > { %v1312_v50 = vadd.f32 %v1293_v10, %v3866_v40 }
 0x21b   : > { %2019 = vmatmul.bf16.gmra.mxu1 %v3714_v62  ;;  %v1506_v16 = vadd.f32 %v1487_v56, %v1312_v50 }
 0x21c   : > { %v1632_v61 = vpop.f32.mrf.mxu3  ;;  %3179 = vmatpush.bf16.msra.mxu3 %v3066_v9  ;;  %2321 = vmatpush.bf16.msra.mxu1 %v3066_v9 }
 0x21d   : > { %v1651_v31 = vadd.f32 %v1632_v61, %v1506_v16 }
 0x21f   : > { %v3938_v36 = vadd.f32 %v1821_v42, %v1651_v31 }
 0x220   : > { %v1295_v59 = vpop.f32.mrf.mxu1  ;;  %v1494_v54 = vpop.f32.mrf.mxu2 }
 0x221   : > { %v1313_v43 = vadd.f32 %v1295_v59, %v1124_v44 }
 0x223   : > { %v1507_v28 = vadd.f32 %v1489_v57, %v1313_v43 }
 0x224   : > { %v1634_v40 = vpop.f32.mrf.mxu3 }
 0x225   : > { %v1652_v62 = vadd.f32 %v1634_v40, %v1507_v28 }
 0x227   : > { %v3943_v53 = vadd.f32 %v1823_v2, %v1652_v62 }
 0x228   : > { %v1298_v14 = vpop.f32.mrf.mxu1  ;;  %v2140_v51 = vpop.f32.mrf.mxu2 }
 0x229   : > { %v1314_v23 = vadd.f32 %v1298_v14, %v3874_v34 }
 0x22b   : > { %2134 = vmatmul.bf16.vlgmr.msrb.gmra.mxu1 %v3466_v20  ;;  %v1508_v12 = vadd.f32 %v1492_v26, %v1314_v23  ;;  %v3065_v20 = vld [vmem:[%s4067_s6] sm:$0xff] }
 0x22c   : > { %v1637_v42 = vpop.f32.mrf.mxu3  ;;  %3180 = vmatpush.bf16.msra.mxu3 %v3065_v20  ;;  %2322 = vmatpush.bf16.msra.mxu1 %v3065_v20 }
 0x22d   : > { %v1653_v55 = vadd.f32 %v1637_v42, %v1508_v12 }
 0x22f   : > { %v3950_v60 = vadd.f32 %v1826_v5, %v1653_v55 }
 0x230   : > { %v1300_v46 = vpop.f32.mrf.mxu1  ;;  %v2142_v30 = vpop.f32.mrf.mxu2 }
 0x234   : > { %v1639_v4 = vpop.f32.mrf.mxu3 }
 0x238   : > { %v1990_v2 = vpop.f32.mrf.mxu1  ;;  %v2145_v24 = vpop.f32.mrf.mxu2 }
 0x239   : > { %v3953_v34 = vadd.f32 %v1990_v2, %v3879_v33  ;;  %v3965_v33 = vld [vmem:[%s4066_s5] ss:$0 sm:$0xff] }
 0x240   : > { %v1992_v19 = vpop.f32.mrf.mxu1  ;;  %v2147_v29 = vpop.f32.mrf.mxu2 }
 0x241   : > { %v3959_v48 = vadd.f32 %v1992_v19, %v3883_v58 }
 0x248   : > { %v1995_v6 = vpop.f32.mrf.mxu1  ;;  %v2150_v0 = vpop.f32.mrf.mxu2 }
 0x249   : > { %v2026_v37 = vadd.f32 %v1995_v6, %v3890_v32 }
 0x24b   : > { %v2171_v5 = vadd.f32 %v2140_v51, %v2026_v37 }
 0x24d   : > { %v2188_v56 = vadd.f32 %v3965_v33, %v2171_v5 }
 0x24f   : > { %v2201_v8 = vmax.f32 %v2188_v56, 0.0 }
 0x250   : > { %v1997_v22 = vpop.f32.mrf.mxu1  ;;  %v2152_v63 = vpop.f32.mrf.mxu2 }
 0x251   : > { %v2027_v11 = vadd.f32 %v1997_v22, %v3894_v38 }
 0x253   : > { %v2172_v13 = vadd.f32 %v2142_v30, %v2027_v11 }
 0x255   : > { %v2189_v58 = vadd.f32 %v3965_v33, %v2172_v13 }
 0x257   : > { %v2202_v45 = vmax.f32 %v2189_v58, 0.0 }
 0x258   : > { %v2000_v15 = vpop.f32.mrf.mxu1  ;;  %v2155_v32 = vpop.f32.mrf.mxu2 }
 0x259   : > { %v2213_v17 = vpack.c.bf16 %v2202_v45, %v2201_v8  ;;  %v2028_v25 = vadd.f32 %v2000_v15, %v3903_v21 }
 0x25b   : > { %2328 = vmatmul.bf16.vlgmr.msra.gmra.mxu3 %v2213_v17  ;;  %v2173_v7 = vadd.f32 %v2145_v24, %v2028_v25 }
 0x25d   : > { %v2190_v38 = vadd.f32 %v3965_v33, %v2173_v7 }
 0x25f   : > { %v2203_v10 = vmax.f32 %v2190_v38, 0.0 }
 0x260   : > { %v2002_v57 = vpop.f32.mrf.mxu1  ;;  %v2157_v35 = vpop.f32.mrf.mxu2 }
 0x261   : > { %v2029_v47 = vadd.f32 %v2002_v57, %v3910_v1 }
 0x263   : > { %v2174_v3 = vadd.f32 %v2147_v29, %v2029_v47  ;;  %v3993_v47 = vld [vmem:[%s3298_s12 + $0x8] sm:$0xff]  }
 0x264   : > { %v3120_v38 = vunpack.c.h.bf16 %v3993_v47 }
 0x265   : > { %v2191_v41 = vadd.f32 %v3965_v33, %v2174_v3 }
 0x267   : > { %v2204_v50 = vmax.f32 %v2191_v41, 0.0 }
 0x268   : > { %v2005_v26 = vpop.f32.mrf.mxu1  ;;  %v2160_v16 = vpop.f32.mrf.mxu2 }
 0x269   : > { %v2214_v61 = vpack.c.bf16 %v2204_v50, %v2203_v10  ;;  %v2030_v31 = vadd.f32 %v2005_v26, %v3916_v52 }
 0x26b   : > { %2333 = vmatmul.bf16.gmra.mxu3 %v2214_v61  ;;  %v2175_v21 = vadd.f32 %v2150_v0, %v2030_v31 }
 0x26d   : > { %v2192_v1 = vadd.f32 %v3965_v33, %v2175_v21  ;;  %v3153_v21 = vld [vmem:[%s3298_s12 + $0x18] sm:$0xff]  }
 0x26f   : > { %v2205_v28 = vmax.f32 %v2192_v1, 0.0 }
 0x270   : > { %v2007_v44 = vpop.f32.mrf.mxu1  ;;  %v2162_v43 = vpop.f32.mrf.mxu2 }
 0x271   : > { %v2031_v59 = vadd.f32 %v2007_v44, %v3921_v39 }
 0x273   : > { %v2176_v54 = vadd.f32 %v2152_v63, %v2031_v59 }
 0x275   : > { %v2193_v49 = vadd.f32 %v3965_v33, %v2176_v54 }
 0x277   : > { %v2206_v40 = vmax.f32 %v2193_v49, 0.0 }
 0x278   : > { %v2010_v62 = vpop.f32.mrf.mxu1  ;;  %v2165_v14 = vpop.f32.mrf.mxu2 }
 0x279   : > { %v2215_v23 = vpack.c.bf16 %v2206_v40, %v2205_v28  ;;  %v2032_v51 = vadd.f32 %v2010_v62, %v3927_v18 }
 0x27b   : > { %2338 = vmatmul.bf16.gmra.mxu3 %v2215_v23  ;;  %v2177_v52 = vadd.f32 %v2155_v32, %v2032_v51 }
 0x27d   : > { %v2194_v39 = vadd.f32 %v3965_v33, %v2177_v52 }
 0x27f   : > { %v2207_v30 = vmax.f32 %v2194_v39, 0.0 }
 0x280   : > { %v2012_v12 = vpop.f32.mrf.mxu1  ;;  %v2167_v55 = vpop.f32.mrf.mxu2 }
 0x281   : > { %v2033_v42 = vadd.f32 %v2012_v12, %v3932_v27 }
 0x283   : > { %v2178_v9 = vadd.f32 %v2157_v35, %v2033_v42  ;;  %v3152_v35 = vld [vmem:[%s3298_s12 + $0x10] sm:$0xff]   ;;  %v3154_v42 = vld [vmem:[%s3298_s12 + $0x20] sm:$0xff]  }
 0x284   : > { %v3123_v3 = vunpack.c.l.bf16 %v3152_v35  ;;  %v3124_v50 = vunpack.c.h.bf16 %v3152_v35 }
 0x285   : > { %v2195_v46 = vadd.f32 %v3965_v33, %v2178_v9  ;;  %v3131_v9 = vunpack.c.l.bf16 %v3154_v42 }
 0x286   : > { %v2378_v41 = vrot.slane %v3123_v3, 3  ;;  %v2380_v61 = vrot.slane %v3124_v50, 3 }
 0x287   : > { %v2208_v4 = vmax.f32 %v2195_v46, 0.0 }
 0x288   : > { %v2015_v2 = vpop.f32.mrf.mxu1  ;;  %v2381_v59 = vsel %vm2057_vm2, %v2378_v41, %v2380_v61 }
 0x289   : > { %v2216_v24 = vpack.c.bf16 %v2208_v4, %v2207_v30  ;;  %v2034_v20 = vadd.f32 %v2015_v2, %v3938_v36  ;;  %v2386_v4 = vrot.slane %v3131_v9, 3 }
 0x28b   : > { %2343 = vmatmul.bf16.gmra.mxu3 %v2216_v24  ;;  %v2179_v19 = vadd.f32 %v2160_v16, %v2034_v20 }
 0x28d   : > { %v2196_v6 = vadd.f32 %v3965_v33, %v2179_v19  ;;  %v3132_v19 = vunpack.c.h.bf16 %v3154_v42 }
 0x28f   : > { %v2209_v37 = vmax.f32 %v2196_v6, 0.0  ;;  %v2388_v6 = vrot.slane %v3132_v19, 3 }
 0x290   : > { %v2017_v18 = vpop.f32.mrf.mxu1 }
 0x291   : > { %v2035_v29 = vadd.f32 %v2017_v18, %v3943_v53 }
 0x293   : > { %v2180_v27 = vadd.f32 %v2162_v43, %v2035_v29  ;;  %v3127_v43 = vunpack.c.l.bf16 %v3153_v21 }
 0x295   : > { %v2197_v0 = vadd.f32 %v3965_v33, %v2180_v27  ;;  %v2382_v49 = vrot.slane %v3127_v43, 3 }
 0x297   : > { %v2210_v5 = vmax.f32 %v2197_v0, 0.0  ;;  %v2383_v62 = vsel %vm2057_vm2, %v2380_v61, %v2382_v49  ;;  %v3155_v0 = vld [vmem:[%s3298_s12 + $0x28] sm:$0xff]  }
 0x298   : > { %v2020_v22 = vpop.f32.mrf.mxu1 }
 0x299   : > { %v2036_v11 = vadd.f32 %v2020_v22, %v3950_v60  ;;  %v2217_v63 = vpack.c.bf16 %v2210_v5, %v2209_v37  ;;  %v2389_v5 = vsel %vm2057_vm2, %v2386_v4, %v2388_v6  ;;  %v3135_v22 = vunpack.c.l.bf16 %v3155_v0 }
 0x29b   : > { %2348 = vmatmul.bf16.gmra.mxu3 %v2217_v63  ;;  %v2181_v56 = vadd.f32 %v2165_v14, %v2036_v11  ;;  %v3128_v14 = vunpack.c.h.bf16 %v3153_v21 }
 0x29d   : > { %v2198_v13 = vadd.f32 %v3965_v33, %v2181_v56  ;;  %v2384_v52 = vrot.slane %v3128_v14, 3  ;;  %v2390_v56 = vrot.slane %v3135_v22, 3  ;;  %v3119_v14 = vunpack.c.l.bf16 %v3993_v47 }
 0x29f   : > { %v2211_v58 = vmax.f32 %v2198_v13, 0.0  ;;  %v2385_v39 = vsel %vm2057_vm2, %v2382_v49, %v2384_v52  ;;  %v2387_v20 = vsel %vm2057_vm2, %v2384_v52, %v2386_v4  ;;  %v2374_v42 = vrot.slane %v3119_v14, 3 }
 0x2a0   : > { %v2022_v36 = vpop.f32.mrf.mxu1 }
 0x2a1   : > { %v2218_v8 = vpack.c.bf16 %v2211_v58, %v2211_v58  ;;  %v2391_v58 = vsel %vm2057_vm2, %v2388_v6, %v2390_v56 }
 0x2a8   : > { %v2135_v53 = vpop.f32.mrf.mxu1 }
 0x2a9   : > { %v2169_v45 = vadd.f32 %v2135_v53, %v3953_v34  ;;  %v3997_v34 = vrot.slane %v3120_v38, 3  ;;  %v3136_v53 = vunpack.c.h.bf16 %v3155_v0 }
 0x2ab   : > { %2353 = vmatmul.bf16.gmra.mxu3 %v2218_v8  ;;  %v2186_v17 = vadd.f32 %v3965_v33, %v2169_v45  ;;  %v2379_v10 = vsel %vm2057_vm2, %v3997_v34, %v2378_v41  ;;  %v2377_v47 = vsel %vm2057_vm2, %v2374_v42, %v3997_v34 }
 0x2ad   : > { %v2199_v25 = vmax.f32 %v2186_v17, 0.0 }
 0x2b0   : > { %v2137_v15 = vpop.f32.mrf.mxu1 }
 0x2b1   : > { %v2170_v60 = vadd.f32 %v2137_v15, %v3959_v48  ;;  %v4002_v48 = vld [vmem:[%s4068_s7] ss:$0 sm:$0xff]  ;;  %v2392_v15 = vrot.slane %v3136_v53, 3 }
 0x2b3   : > { %v2187_v32 = vadd.f32 %v3965_v33, %v2170_v60  ;;  %v3156_v60 = vld [vmem:[%s3298_s12 + $0x30] sm:$0xff]  }
 0x2b5   : > { %v2200_v7 = vmax.f32 %v2187_v32, 0.0 }
 0x2b7   : > { %v2212_v57 = vpack.c.bf16 %v2200_v7, %v2199_v25  ;;  %v2393_v25 = vsel %vm2057_vm2, %v2390_v56, %v2392_v15  ;;  %v3139_v7 = vunpack.c.l.bf16 %v3156_v60 }
 0x2b9   : > { %2323 = vmatmul.bf16.vlgmr.msra.gmra.mxu1 %v2212_v57  ;;  %v2394_v38 = vrot.slane %v3139_v7, 3 }
 0x2de   : > { %v2329_v33 = vpop.f32.mrf.mxu3 }
 0x2df   : > { %v2330_v26 = vadd.f32 %v4002_v48, %v2329_v33  ;;  %v2395_v33 = vsel %vm2057_vm2, %v2392_v15, %v2394_v38 }
 0x2e1   : > { %v2415_v16 = vadd.f32 %v2379_v10, %v2330_v26  ;;  %v3140_v10 = vunpack.c.h.bf16 %v3156_v60 }
 0x2e3   : > { %v2428_v31 = vmax.f32 %v2415_v16, 0.0  ;;  %v2396_v16 = vrot.slane %v3140_v10, 3 }
 0x2e5   : > { %2441 = vst [vmem:[%s4011_s18 + $0x10] sm:$0xff] %v2428_v31  ;;  %v2232_v31 = vld [vmem:[%s3298_s12 + $0x38] sm:$0x3] }
 0x2e6   : > { %v2331_v44 = vpop.f32.mrf.mxu3 }
 0x2e7   : > { %v2332_v1 = vadd.f32 %v4002_v48, %v2331_v44  ;;  %v2397_v44 = vsel %vm2057_vm2, %v2394_v38, %v2396_v16 }
 0x2e9   : > { %v2416_v54 = vadd.f32 %v2381_v59, %v2332_v1  ;;  %v2246_v59 = vunpack.c.l.bf16 %v2232_v31 }
 0x2eb   : > { %v2429_v28 = vmax.f32 %v2416_v54, 0.0  ;;  %v2398_v54 = vrot.slane %v2246_v59, 3 }
 0x2ed   : > { %2442 = vst [vmem:[%s4011_s18 + $0x18] sm:$0xff] %v2429_v28  ;;  %v2219_v28 = vld [vmem:[%s3298_s12 + $0x4] sm:$0xe] }
 0x2ee   : > { %v2334_v40 = vpop.f32.mrf.mxu3 }
 0x2ef   : > { %v2335_v23 = vadd.f32 %v4002_v48, %v2334_v40 }
 0x2f1   : > { %v2417_v51 = vadd.f32 %v2383_v62, %v2335_v23  ;;  %v2399_v62 = vsel %vm2057_vm2, %v2396_v16, %v2398_v54  ;;  %v2233_v23 = vunpack.c.l.bf16 %v2219_v28 }
 0x2f3   : > { %v2430_v12 = vmax.f32 %v2417_v51, 0.0 }
 0x2f5   : > { %2443 = vst [vmem:[%s4011_s18 + $0x20] sm:$0xff] %v2430_v12  ;;  %v2373_v12 = vrot.slane %v2233_v23, 3 }
 0x2f6   : > { %v2336_v55 = vpop.f32.mrf.mxu3 }
 0x2f7   : > { %v2337_v46 = vadd.f32 %v4002_v48, %v2336_v55  ;;  %v2375_v9 = vsel %vm2057_vm2, %v2373_v12, %v2374_v42 }
 0x2f9   : > { %v2418_v30 = vadd.f32 %v2385_v39, %v2337_v46 }
 0x2fb   : > { %v2431_v2 = vmax.f32 %v2418_v30, 0.0 }
 0x2fd   : > { %2444 = vst [vmem:[%s4011_s18 + $0x28] sm:$0xff] %v2431_v2 }
 0x2fe   : > { %v2339_v24 = vpop.f32.mrf.mxu3 }
 0x2ff   : > { %v2340_v18 = vadd.f32 %v4002_v48, %v2339_v24 }
 0x301   : > { %v2419_v29 = vadd.f32 %v2387_v20, %v2340_v18 }
 0x303   : > { %v2432_v27 = vmax.f32 %v2419_v29, 0.0 }
 0x305   : > { %2445 = vst [vmem:[%s4011_s18 + $0x30] sm:$0xff] %v2432_v27 }
 0x306   : > { %v2341_v37 = vpop.f32.mrf.mxu3 }
 0x307   : > { %v2342_v11 = vadd.f32 %v4002_v48, %v2341_v37 }
 0x309   : > { %v2420_v63 = vadd.f32 %v2389_v5, %v2342_v11 }
 0x30b   : > { %v2433_v36 = vmax.f32 %v2420_v63, 0.0 }
 0x30d   : > { %2446 = vst [vmem:[%s4011_s18 + $0x38] sm:$0xff] %v2433_v36 }
 0x30e   : > { %v2344_v13 = vpop.f32.mrf.mxu3 }
 0x30f   : > { %v2345_v8 = vadd.f32 %v4002_v48, %v2344_v13 }
 0x311   : > { %v2421_v45 = vadd.f32 %v2391_v58, %v2345_v8 }
 0x313   : > { %v2434_v17 = vmax.f32 %v2421_v45, 0.0 }
 0x315   : > { %2447 = vst [vmem:[%s4011_s18 + $0x40] sm:$0xff] %v2434_v17 }
 0x316   : > { %v2346_v32 = vpop.f32.mrf.mxu3 }
 0x317   : > { %v2347_v57 = vadd.f32 %v4002_v48, %v2346_v32 }
 0x319   : > { %v2422_v35 = vadd.f32 %v2393_v25, %v2347_v57 }
 0x31b   : > { %v2435_v3 = vmax.f32 %v2422_v35, 0.0 }
 0x31d   : > { %2448 = vst [vmem:[%s4011_s18 + $0x48] sm:$0xff] %v2435_v3 }
 0x31e   : > { %v2349_v41 = vpop.f32.mrf.mxu3 }
 0x31f   : > { %v2350_v50 = vadd.f32 %v4002_v48, %v2349_v41 }
 0x321   : > { %v2423_v26 = vadd.f32 %v2395_v33, %v2350_v50 }
 0x323   : > { %v2436_v61 = vmax.f32 %v2423_v26, 0.0 }
 0x325   : > { %2449 = vst [vmem:[%s4011_s18 + $0x50] sm:$0xff] %v2436_v61 }
 0x326   : > { %v2351_v21 = vpop.f32.mrf.mxu3 }
 0x327   : > { %v2352_v43 = vadd.f32 %v4002_v48, %v2351_v21 }
 0x329   : > { %v2424_v1 = vadd.f32 %v2397_v44, %v2352_v43 }
 0x32b   : > { %v2437_v49 = vmax.f32 %v2424_v1, 0.0 }
 0x32d   : > { %2450 = vst [vmem:[%s4011_s18 + $0x58] sm:$0xff] %v2437_v49 }
 0x32e   : > { %v2354_v40 = vpop.f32.mrf.mxu3 }
 0x32f   : > { %v2355_v51 = vadd.f32 %v4002_v48, %v2354_v40 }
 0x331   : > { %v2425_v52 = vadd.f32 %v2399_v62, %v2355_v51 }
 0x333   : > { %v2438_v55 = vmax.f32 %v2425_v52, 0.0 }
 0x335   : > { %2451 = vst [vmem:[%s4011_s18 + $0x60] sm:$0xff] %v2438_v55 }
 0x336   : > { %v2324_v39 = vpop.f32.mrf.mxu1  ;;  %v2356_v46 = vpop.f32.mrf.mxu3 }
 0x337   : > { %v2325_v30 = vadd.f32 %v4002_v48, %v2324_v39 }
 0x339   : > { %v2413_v4 = vadd.f32 %v2375_v9, %v2325_v30 }
 0x33b   : > { %v2426_v2 = vmax.f32 %v2413_v4, 0.0 }
 0x33d   : > { %2439 = vst [vmem:[%s4011_s18] sm:$0xff] %v2426_v2 }
 0x33e   : > { %v2326_v24 = vpop.f32.mrf.mxu1 }
 0x33f   : > { %v2327_v20 = vadd.f32 %v4002_v48, %v2326_v24 }
 0x341   : > { %v2414_v19 = vadd.f32 %v2377_v47, %v2327_v20 }
 0x343   : > { %v2427_v18 = vmax.f32 %v2414_v19, 0.0 }
 0x345   : > { %2440 = vst [vmem:[%s4011_s18 + $0x8] sm:$0xff] %v2427_v18 }
 0x346 PF: > { %s18_s27 = sadd.s32 1, %s3203_s27  }
 0x347   : > { %p15_p4 = scmp.ge.s32.totalorder %s18_s27, 4  }
 0x349   :  { %17 = sbr.rel (!%p15_p4) target bundleno = 1 (0x1), region = 82 }

</bundles_post_ra>
